<compile_context>
chip_gen: v5e
topology: v5e:2x2
jax: 0.10.0
libtpu: 0.0.40
codegen_flags: <defaults>
</compile_context>

<pallas_src>
import jax
import jax.numpy as jnp
from jax.experimental import pallas as pl
from jax.experimental.pallas import tpu as pltpu


_NEG_SLOPE = 0.2
_BT_MAX = 8  # batch tile per grid step


def _leaky_relu(x):
    return jnp.where(x >= 0.0, x, _NEG_SLOPE * x)


# ----------------------------------------------------------------------------
# Fused kernel: conv1 -> LeakyReLU -> conv2 -> LeakyReLU -> Linear(2048 -> 1)
# ----------------------------------------------------------------------------
def _fused_disc_kernel(cols1_ref, w1_ref, w2_ref, w3_ref, out_ref, f1_ref):
    """Per grid step: BT batch elements.

    cols1_ref: (BT*64, 16)  bf16  conv1 im2col, rows = (b, oh, ow%2, ow//2)
    w1_ref:    (16, 64)     bf16  conv1 weight, rows = (kh, kw), cols = c_out
    w2_ref:    (1024, 128)  bf16  conv2 weight, rows = (kh*4+kw)*64 + c_in
    w3_ref:    (16, 128)    f32   linear weight, [oh2*4+ow2, c]
    out_ref:   (BT, 1)      f32
    f1_ref:    (BT, 80, 64) bf16  VMEM scratch: interior rows of the zero-padded
               conv1 output, flat index = oh*10 + slot,
               slot = (w_pad%2)*5 + w_pad//2  (slot 0 and slot 9 are the
               left/right zero padding of each row).
    """
    bt = out_ref.shape[0]

    # ---- conv1 (1 -> 64, k4 s2 p1) + LeakyReLU: one K=16 MXU matmul ----
    y1 = jnp.dot(cols1_ref[...], w1_ref[...],
                 preferred_element_type=jnp.float32)            # (BT*64, 64) f32
    y1 = _leaky_relu(y1)
    y1 = y1.reshape(bt, 64, 64).astype(jnp.bfloat16)            # rows: (oh, ow%2, ow//2)

    # ---- stash conv1 output into the parity-packed VMEM scratch ----
    # Each padded row is built in registers (zero pad slots included) and
    # stored exactly once.
    zpad1 = jnp.zeros((bt, 1, 64), jnp.bfloat16)
    for oh in range(8):                                         # static unroll
        even = y1[:, oh * 8 + 0: oh * 8 + 4, :]                 # ow = 0,2,4,6 -> slots 5..8
        odd = y1[:, oh * 8 + 4: oh * 8 + 8, :]                  # ow = 1,3,5,7 -> slots 1..4
        row = jnp.concatenate([zpad1, odd, even, zpad1], axis=1)  # slots 0..9
        f1_ref[:, oh * 10: oh * 10 + 10, :] = row

    # ---- conv2 (64 -> 128, k4 s2 p1): 16 accumulating tap matmuls ----
    zero_slab = jnp.zeros((bt, 4, 64), jnp.bfloat16)
    acc = jnp.zeros((bt * 16, 128), jnp.float32)
    for ki in range(4):
        for kj in range(4):
            tap = ki * 4 + kj
            coff = (kj % 2) * 5 + kj // 2
            rows = []
            for oh2 in range(4):
                r = 2 * oh2 + ki                                # padded input row 0..9
                if r == 0 or r == 9:                            # top/bottom zero padding
                    rows.append(zero_slab)
                else:
                    base = (r - 1) * 10 + coff
                    rows.append(f1_ref[:, base: base + 4, :])   # (BT, 4, 64)
            slab = jnp.concatenate(rows, axis=1)                # (BT, 16, 64) bf16
            slab = slab.reshape(bt * 16, 64)                    # rows = (b, oh2, ow2)
            acc = acc + jnp.dot(slab, w2_ref[tap * 64:(tap + 1) * 64, :],
                                preferred_element_type=jnp.float32)
    f2 = _leaky_relu(acc)                                       # (BT*16, 128) f32

    # ---- Flatten + Linear(2048 -> 1, bias=False) as a VPU multiply-reduce ----
    prod = f2.reshape(bt, 16, 128) * w3_ref[...][None, :, :]
    out = jnp.sum(jnp.sum(prod, axis=2), axis=1, keepdims=True)  # (BT, 1)
    out_ref[...] = out.astype(out_ref.dtype)


# ----------------------------------------------------------------------------
# Plain-JAX glue: conv1 patch matrix, spectral norm, weight packing
# ----------------------------------------------------------------------------
def _conv1_patches(x):
    """x: (N, 1, 16, 16) f32 -> (N*64, 16) bf16 patch matrix.

    Column order (kh, kw) matches the flattened conv1 weight.  Row order is
    (b, oh, ow % 2, ow // 2) so the conv1 output can be written into the
    parity-packed VMEM scratch with unit-stride stores only.
    """
    n = x.shape[0]
    xp = jnp.pad(x, ((0, 0), (0, 0), (1, 1), (1, 1)))
    taps = []
    for i in range(4):
        for j in range(4):
            taps.append(xp[:, 0, i:i + 16:2, j:j + 16:2])       # (N, 8, 8)
    p = jnp.stack(taps, axis=-1)                                # (N, 8, 8, 16)
    p = p.reshape(n, 8, 4, 2, 16).transpose(0, 1, 3, 2, 4)      # (N, oh, ow%2, ow//2, 16)
    return p.reshape(n * 64, 16).astype(jnp.bfloat16)


def _spectral_normalize(w2d, n_iter=30):
    """Divide a (rows, cols) matrix by its largest singular value (power iter)."""
    u = jnp.ones((w2d.shape[0],), dtype=w2d.dtype)
    v = None
    for _ in range(n_iter):
        v = w2d.T @ u
        v = v / (jnp.linalg.norm(v) + 1e-12)
        u = w2d @ v
        u = u / (jnp.linalg.norm(u) + 1e-12)
    sigma = u @ (w2d @ v)
    return w2d / sigma


def init_params(key):
    k1, k2, k3 = jax.random.split(key, 3)
    # Conv2d(1, 64, 4, 2, 1, bias=False)   -> weight (64, 1, 4, 4)
    w1 = 0.05 * jax.random.normal(k1, (64, 1, 4, 4), dtype=jnp.float32)
    # Conv2d(64, 128, 4, 2, 1, bias=False) -> weight (128, 64, 4, 4)
    w2 = 0.05 * jax.random.normal(k2, (128, 64, 4, 4), dtype=jnp.float32)
    # Linear(128*4*4, 1, bias=False)       -> weight (1, 2048)
    w3 = 0.05 * jax.random.normal(k3, (1, 128 * 4 * 4), dtype=jnp.float32)

    w1_sn = _spectral_normalize(w1.reshape(64, -1))             # (64, 16)
    w2_sn = _spectral_normalize(w2.reshape(128, -1))            # (128, 1024)
    w3_sn = _spectral_normalize(w3)                             # (1, 2048)

    # Pre-pack ONCE into the exact layouts the kernel consumes (no per-call .T).
    w1p = w1_sn.T.astype(jnp.bfloat16)                                          # (16, 64)
    w2p = (w2_sn.reshape(128, 64, 4, 4).transpose(2, 3, 1, 0)
           .reshape(1024, 128).astype(jnp.bfloat16))                            # (1024, 128)
    w3p = w3_sn.reshape(128, 4, 4).transpose(1, 2, 0).reshape(16, 128)          # (16, 128) f32
    return w1p, w2p, w3p


# ----------------------------------------------------------------------------
# Forward pass
# ----------------------------------------------------------------------------
def wgan_discriminator_forward(x, params):
    w1p, w2p, w3p = params
    n = x.shape[0]
    cols1 = _conv1_patches(x)                                   # (N*64, 16) bf16

    # Batch tile per grid step; pad the batch to a multiple of the tile so
    # per-step VMEM use is bounded for any N.
    if n <= _BT_MAX:
        bt, n_pad = n, n
    else:
        bt = _BT_MAX
        n_pad = ((n + bt - 1) // bt) * bt
        if n_pad != n:
            cols1 = jnp.pad(cols1, ((0, (n_pad - n) * 64), (0, 0)))
    grid = (n_pad // bt,)

    flops = 2 * n_pad * (64 * 16 * 64 + 16 * 1024 * 128 + 2048)
    bytes_accessed = (cols1.size * 2 + w1p.size * 2 + w2p.size * 2
                      + w3p.size * 4 + n_pad * 4)

    out = pl.pallas_call(
        _fused_disc_kernel,
        out_shape=jax.ShapeDtypeStruct((n_pad, 1), jnp.float32),
        grid=grid,
        in_specs=[
            pl.BlockSpec((bt * 64, 16), lambda b: (b, 0)),
            pl.BlockSpec((16, 64), lambda b: (0, 0)),
            pl.BlockSpec((1024, 128), lambda b: (0, 0)),
            pl.BlockSpec((16, 128), lambda b: (0, 0)),
        ],
        out_specs=pl.BlockSpec((bt, 1), lambda b: (b, 0)),
        scratch_shapes=[pltpu.VMEM((bt, 80, 64), jnp.bfloat16)],
        compiler_params=pltpu.CompilerParams(
            dimension_semantics=("parallel",)),
        cost_estimate=pl.CostEstimate(
            flops=flops, transcendentals=0, bytes_accessed=bytes_accessed),
    )(cols1, w1p, w2p, w3p)

    return out[:n] if n_pad != n else out


if __name__ == "__main__":
    key = jax.random.PRNGKey(0)
    kx, kp = jax.random.split(key)

    # Input implied by the 128*4*4 flatten: (N, 1, 16, 16).  Small batch = 2.
    x = jax.random.normal(kx, (2, 1, 16, 16), dtype=jnp.float32)
    params = init_params(kp)

    fwd = jax.jit(wgan_discriminator_forward)
    out = fwd(x, params)
    jax.block_until_ready(out)

    assert out.shape == (2, 1), out.shape
    assert out.dtype == jnp.float32
    print("KERNEL_OK")
</pallas_src>

<mosaic_0001>
module attributes {stable_mosaic.version = 11 : i64} {
  func.func @_fused_disc_kernel(%arg0: i32, %arg1: memref<128x16xbf16, #tpu.memory_space<vmem>>, %arg2: memref<16x64xbf16, #tpu.memory_space<vmem>>, %arg3: memref<1024x128xbf16, #tpu.memory_space<vmem>>, %arg4: memref<16x128xf32, #tpu.memory_space<vmem>>, %arg5: memref<2x1xf32, #tpu.memory_space<vmem>>, %arg6: memref<2x80x64xbf16, #tpu.memory_space<vmem>>) attributes {dimension_semantics = [#tpu.dimension_semantics<parallel>], iteration_bounds = array<i64: 1>, scalar_prefetch = 0 : i64, scratch_operands = 1 : i64, tpu.core_type = #tpu.core_type<tc>, window_params = [{transform_indices = @transform_0, window_bounds = array<i64: 128, 16>}, {pipeline_mode = #tpu.pipeline_mode<synchronous>, transform_indices = @transform_1, window_bounds = array<i64: 16, 64>}, {pipeline_mode = #tpu.pipeline_mode<synchronous>, transform_indices = @transform_2, window_bounds = array<i64: 1024, 128>}, {pipeline_mode = #tpu.pipeline_mode<synchronous>, transform_indices = @transform_3, window_bounds = array<i64: 16, 128>}, {transform_indices = @transform_4, window_bounds = array<i64: 2, 1>}]} {
    %c0 = arith.constant 0 : index
    %c0_0 = arith.constant 0 : index
    %0 = vector.load %arg1[%c0, %c0_0] : memref<128x16xbf16, #tpu.memory_space<vmem>>, vector<128x16xbf16>
    %c0_1 = arith.constant 0 : index
    %c0_2 = arith.constant 0 : index
    %1 = vector.load %arg2[%c0_1, %c0_2] : memref<16x64xbf16, #tpu.memory_space<vmem>>, vector<16x64xbf16>
    %cst = arith.constant dense<0.000000e+00> : vector<128x64xf32>
    %2 = tpu.matmul %0, %1, %cst {dimension_numbers = #tpu.dot_dimension_numbers<[1], [0], [0], [1], [0, 0, 1, 1], [], []>} : vector<128x16xbf16>, vector<16x64xbf16>, vector<128x64xf32> -> vector<128x64xf32>
    %cst_3 = arith.constant 0.000000e+00 : f32
    %3 = vector.broadcast %cst_3 : f32 to vector<128x64xf32>
    %4 = arith.cmpf oge, %2, %3 : vector<128x64xf32>
    %cst_4 = arith.constant 2.000000e-01 : f32
    %5 = vector.broadcast %cst_4 : f32 to vector<128x64xf32>
    %6 = arith.mulf %5, %2 : vector<128x64xf32>
    %7 = arith.select %4, %2, %6 : vector<128x64xi1>, vector<128x64xf32>
    %8 = vector.shape_cast %7 : vector<128x64xf32> to vector<2x64x64xf32>
    %9 = arith.truncf %8 : vector<2x64x64xf32> to vector<2x64x64xbf16>
    %cst_5 = arith.constant 0.000000e+00 : bf16
    %10 = vector.broadcast %cst_5 : bf16 to vector<2x1x64xbf16>
    %11 = vector.extract_strided_slice %9 {offsets = [0, 0, 0], sizes = [2, 4, 64], strides = [1, 1, 1]} : vector<2x64x64xbf16> to vector<2x4x64xbf16>
    %12 = vector.extract_strided_slice %9 {offsets = [0, 4, 0], sizes = [2, 4, 64], strides = [1, 1, 1]} : vector<2x64x64xbf16> to vector<2x4x64xbf16>
    %13 = tpu.concatenate %10, %12, %11, %10 in 1 : vector<2x1x64xbf16>, vector<2x4x64xbf16>, vector<2x4x64xbf16>, vector<2x1x64xbf16> -> vector<2x10x64xbf16>
    %c0_6 = arith.constant 0 : index
    %c0_7 = arith.constant 0 : index
    %c0_8 = arith.constant 0 : index
    %14 = vector.load %arg6[%c0_6, %c0_7, %c0_8] : memref<2x80x64xbf16, #tpu.memory_space<vmem>>, vector<2x10x64xbf16>
    tpu.vector_store %arg6[%c0_6, %c0_7, %c0_8], %13 {strides = array<i32>} : memref<2x80x64xbf16, #tpu.memory_space<vmem>>, vector<2x10x64xbf16>,
    %15 = vector.extract_strided_slice %9 {offsets = [0, 8, 0], sizes = [2, 4, 64], strides = [1, 1, 1]} : vector<2x64x64xbf16> to vector<2x4x64xbf16>
    %16 = vector.extract_strided_slice %9 {offsets = [0, 12, 0], sizes = [2, 4, 64], strides = [1, 1, 1]} : vector<2x64x64xbf16> to vector<2x4x64xbf16>
    %17 = tpu.concatenate %10, %16, %15, %10 in 1 : vector<2x1x64xbf16>, vector<2x4x64xbf16>, vector<2x4x64xbf16>, vector<2x1x64xbf16> -> vector<2x10x64xbf16>
    %c0_9 = arith.constant 0 : index
    %c10 = arith.constant 10 : index
    %c0_10 = arith.constant 0 : index
    %18 = vector.load %arg6[%c0_9, %c10, %c0_10] : memref<2x80x64xbf16, #tpu.memory_space<vmem>>, vector<2x10x64xbf16>
    tpu.vector_store %arg6[%c0_9, %c10, %c0_10], %17 {strides = array<i32>} : memref<2x80x64xbf16, #tpu.memory_space<vmem>>, vector<2x10x64xbf16>,
    %19 = vector.extract_strided_slice %9 {offsets = [0, 16, 0], sizes = [2, 4, 64], strides = [1, 1, 1]} : vector<2x64x64xbf16> to vector<2x4x64xbf16>
    %20 = vector.extract_strided_slice %9 {offsets = [0, 20, 0], sizes = [2, 4, 64], strides = [1, 1, 1]} : vector<2x64x64xbf16> to vector<2x4x64xbf16>
    %21 = tpu.concatenate %10, %20, %19, %10 in 1 : vector<2x1x64xbf16>, vector<2x4x64xbf16>, vector<2x4x64xbf16>, vector<2x1x64xbf16> -> vector<2x10x64xbf16>
    %c0_11 = arith.constant 0 : index
    %c20 = arith.constant 20 : index
    %c0_12 = arith.constant 0 : index
    %22 = vector.load %arg6[%c0_11, %c20, %c0_12] : memref<2x80x64xbf16, #tpu.memory_space<vmem>>, vector<2x10x64xbf16>
    tpu.vector_store %arg6[%c0_11, %c20, %c0_12], %21 {strides = array<i32>} : memref<2x80x64xbf16, #tpu.memory_space<vmem>>, vector<2x10x64xbf16>,
    %23 = vector.extract_strided_slice %9 {offsets = [0, 24, 0], sizes = [2, 4, 64], strides = [1, 1, 1]} : vector<2x64x64xbf16> to vector<2x4x64xbf16>
    %24 = vector.extract_strided_slice %9 {offsets = [0, 28, 0], sizes = [2, 4, 64], strides = [1, 1, 1]} : vector<2x64x64xbf16> to vector<2x4x64xbf16>
    %25 = tpu.concatenate %10, %24, %23, %10 in 1 : vector<2x1x64xbf16>, vector<2x4x64xbf16>, vector<2x4x64xbf16>, vector<2x1x64xbf16> -> vector<2x10x64xbf16>
    %c0_13 = arith.constant 0 : index
    %c30 = arith.constant 30 : index
    %c0_14 = arith.constant 0 : index
    %26 = vector.load %arg6[%c0_13, %c30, %c0_14] : memref<2x80x64xbf16, #tpu.memory_space<vmem>>, vector<2x10x64xbf16>
    tpu.vector_store %arg6[%c0_13, %c30, %c0_14], %25 {strides = array<i32>} : memref<2x80x64xbf16, #tpu.memory_space<vmem>>, vector<2x10x64xbf16>,
    %27 = vector.extract_strided_slice %9 {offsets = [0, 32, 0], sizes = [2, 4, 64], strides = [1, 1, 1]} : vector<2x64x64xbf16> to vector<2x4x64xbf16>
    %28 = vector.extract_strided_slice %9 {offsets = [0, 36, 0], sizes = [2, 4, 64], strides = [1, 1, 1]} : vector<2x64x64xbf16> to vector<2x4x64xbf16>
    %29 = tpu.concatenate %10, %28, %27, %10 in 1 : vector<2x1x64xbf16>, vector<2x4x64xbf16>, vector<2x4x64xbf16>, vector<2x1x64xbf16> -> vector<2x10x64xbf16>
    %c0_15 = arith.constant 0 : index
    %c40 = arith.constant 40 : index
    %c0_16 = arith.constant 0 : index
    %30 = vector.load %arg6[%c0_15, %c40, %c0_16] : memref<2x80x64xbf16, #tpu.memory_space<vmem>>, vector<2x10x64xbf16>
    tpu.vector_store %arg6[%c0_15, %c40, %c0_16], %29 {strides = array<i32>} : memref<2x80x64xbf16, #tpu.memory_space<vmem>>, vector<2x10x64xbf16>,
    %31 = vector.extract_strided_slice %9 {offsets = [0, 40, 0], sizes = [2, 4, 64], strides = [1, 1, 1]} : vector<2x64x64xbf16> to vector<2x4x64xbf16>
    %32 = vector.extract_strided_slice %9 {offsets = [0, 44, 0], sizes = [2, 4, 64], strides = [1, 1, 1]} : vector<2x64x64xbf16> to vector<2x4x64xbf16>
    %33 = tpu.concatenate %10, %32, %31, %10 in 1 : vector<2x1x64xbf16>, vector<2x4x64xbf16>, vector<2x4x64xbf16>, vector<2x1x64xbf16> -> vector<2x10x64xbf16>
    %c0_17 = arith.constant 0 : index
    %c50 = arith.constant 50 : index
    %c0_18 = arith.constant 0 : index
    %34 = vector.load %arg6[%c0_17, %c50, %c0_18] : memref<2x80x64xbf16, #tpu.memory_space<vmem>>, vector<2x10x64xbf16>
    tpu.vector_store %arg6[%c0_17, %c50, %c0_18], %33 {strides = array<i32>} : memref<2x80x64xbf16, #tpu.memory_space<vmem>>, vector<2x10x64xbf16>,
    %35 = vector.extract_strided_slice %9 {offsets = [0, 48, 0], sizes = [2, 4, 64], strides = [1, 1, 1]} : vector<2x64x64xbf16> to vector<2x4x64xbf16>
    %36 = vector.extract_strided_slice %9 {offsets = [0, 52, 0], sizes = [2, 4, 64], strides = [1, 1, 1]} : vector<2x64x64xbf16> to vector<2x4x64xbf16>
    %37 = tpu.concatenate %10, %36, %35, %10 in 1 : vector<2x1x64xbf16>, vector<2x4x64xbf16>, vector<2x4x64xbf16>, vector<2x1x64xbf16> -> vector<2x10x64xbf16>
    %c0_19 = arith.constant 0 : index
    %c60 = arith.constant 60 : index
    %c0_20 = arith.constant 0 : index
    %38 = vector.load %arg6[%c0_19, %c60, %c0_20] : memref<2x80x64xbf16, #tpu.memory_space<vmem>>, vector<2x10x64xbf16>
    tpu.vector_store %arg6[%c0_19, %c60, %c0_20], %37 {strides = array<i32>} : memref<2x80x64xbf16, #tpu.memory_space<vmem>>, vector<2x10x64xbf16>,
    %39 = vector.extract_strided_slice %9 {offsets = [0, 56, 0], sizes = [2, 4, 64], strides = [1, 1, 1]} : vector<2x64x64xbf16> to vector<2x4x64xbf16>
    %40 = vector.extract_strided_slice %9 {offsets = [0, 60, 0], sizes = [2, 4, 64], strides = [1, 1, 1]} : vector<2x64x64xbf16> to vector<2x4x64xbf16>
    %41 = tpu.concatenate %10, %40, %39, %10 in 1 : vector<2x1x64xbf16>, vector<2x4x64xbf16>, vector<2x4x64xbf16>, vector<2x1x64xbf16> -> vector<2x10x64xbf16>
    %c0_21 = arith.constant 0 : index
    %c70 = arith.constant 70 : index
    %c0_22 = arith.constant 0 : index
    %42 = vector.load %arg6[%c0_21, %c70, %c0_22] : memref<2x80x64xbf16, #tpu.memory_space<vmem>>, vector<2x10x64xbf16>
    tpu.vector_store %arg6[%c0_21, %c70, %c0_22], %41 {strides = array<i32>} : memref<2x80x64xbf16, #tpu.memory_space<vmem>>, vector<2x10x64xbf16>,
    %cst_23 = arith.constant 0.000000e+00 : bf16
    %43 = vector.broadcast %cst_23 : bf16 to vector<2x4x64xbf16>
    %cst_24 = arith.constant 0.000000e+00 : f32
    %44 = vector.broadcast %cst_24 : f32 to vector<32x128xf32>
    %c0_25 = arith.constant 0 : index
    %c10_26 = arith.constant 10 : index
    %c0_27 = arith.constant 0 : index
    %45 = vector.load %arg6[%c0_25, %c10_26, %c0_27] : memref<2x80x64xbf16, #tpu.memory_space<vmem>>, vector<2x4x64xbf16>
    %c0_28 = arith.constant 0 : index
    %c30_29 = arith.constant 30 : index
    %c0_30 = arith.constant 0 : index
    %46 = vector.load %arg6[%c0_28, %c30_29, %c0_30] : memref<2x80x64xbf16, #tpu.memory_space<vmem>>, vector<2x4x64xbf16>
    %c0_31 = arith.constant 0 : index
    %c50_32 = arith.constant 50 : index
    %c0_33 = arith.constant 0 : index
    %47 = vector.load %arg6[%c0_31, %c50_32, %c0_33] : memref<2x80x64xbf16, #tpu.memory_space<vmem>>, vector<2x4x64xbf16>
    %48 = tpu.concatenate %43, %45, %46, %47 in 1 : vector<2x4x64xbf16>, vector<2x4x64xbf16>, vector<2x4x64xbf16>, vector<2x4x64xbf16> -> vector<2x16x64xbf16>
    %49 = vector.shape_cast %48 : vector<2x16x64xbf16> to vector<32x64xbf16>
    %c0_34 = arith.constant 0 : index
    %c0_35 = arith.constant 0 : index
    %50 = vector.load %arg3[%c0_34, %c0_35] : memref<1024x128xbf16, #tpu.memory_space<vmem>>, vector<64x128xbf16>
    %cst_36 = arith.constant dense<0.000000e+00> : vector<32x128xf32>
    %51 = tpu.matmul %49, %50, %cst_36 {dimension_numbers = #tpu.dot_dimension_numbers<[1], [0], [0], [1], [0, 0, 1, 1], [], []>} : vector<32x64xbf16>, vector<64x128xbf16>, vector<32x128xf32> -> vector<32x128xf32>
    %52 = arith.addf %44, %51 : vector<32x128xf32>
    %c0_37 = arith.constant 0 : index
    %c15 = arith.constant 15 : index
    %c0_38 = arith.constant 0 : index
    %53 = vector.load %arg6[%c0_37, %c15, %c0_38] : memref<2x80x64xbf16, #tpu.memory_space<vmem>>, vector<2x4x64xbf16>
    %c0_39 = arith.constant 0 : index
    %c35 = arith.constant 35 : index
    %c0_40 = arith.constant 0 : index
    %54 = vector.load %arg6[%c0_39, %c35, %c0_40] : memref<2x80x64xbf16, #tpu.memory_space<vmem>>, vector<2x4x64xbf16>
    %c0_41 = arith.constant 0 : index
    %c55 = arith.constant 55 : index
    %c0_42 = arith.constant 0 : index
    %55 = vector.load %arg6[%c0_41, %c55, %c0_42] : memref<2x80x64xbf16, #tpu.memory_space<vmem>>, vector<2x4x64xbf16>
    %56 = tpu.concatenate %43, %53, %54, %55 in 1 : vector<2x4x64xbf16>, vector<2x4x64xbf16>, vector<2x4x64xbf16>, vector<2x4x64xbf16> -> vector<2x16x64xbf16>
    %57 = vector.shape_cast %56 : vector<2x16x64xbf16> to vector<32x64xbf16>
    %c64 = arith.constant 64 : index
    %c0_43 = arith.constant 0 : index
    %58 = vector.load %arg3[%c64, %c0_43] : memref<1024x128xbf16, #tpu.memory_space<vmem>>, vector<64x128xbf16>
    %cst_44 = arith.constant dense<0.000000e+00> : vector<32x128xf32>
    %59 = tpu.matmul %57, %58, %cst_44 {dimension_numbers = #tpu.dot_dimension_numbers<[1], [0], [0], [1], [0, 0, 1, 1], [], []>} : vector<32x64xbf16>, vector<64x128xbf16>, vector<32x128xf32> -> vector<32x128xf32>
    %60 = arith.addf %52, %59 : vector<32x128xf32>
    %c0_45 = arith.constant 0 : index
    %c11 = arith.constant 11 : index
    %c0_46 = arith.constant 0 : index
    %61 = vector.load %arg6[%c0_45, %c11, %c0_46] : memref<2x80x64xbf16, #tpu.memory_space<vmem>>, vector<2x4x64xbf16>
    %c0_47 = arith.constant 0 : index
    %c31 = arith.constant 31 : index
    %c0_48 = arith.constant 0 : index
    %62 = vector.load %arg6[%c0_47, %c31, %c0_48] : memref<2x80x64xbf16, #tpu.memory_space<vmem>>, vector<2x4x64xbf16>
    %c0_49 = arith.constant 0 : index
    %c51 = arith.constant 51 : index
    %c0_50 = arith.constant 0 : index
    %63 = vector.load %arg6[%c0_49, %c51, %c0_50] : memref<2x80x64xbf16, #tpu.memory_space<vmem>>, vector<2x4x64xbf16>
    %64 = tpu.concatenate %43, %61, %62, %63 in 1 : vector<2x4x64xbf16>, vector<2x4x64xbf16>, vector<2x4x64xbf16>, vector<2x4x64xbf16> -> vector<2x16x64xbf16>
    %65 = vector.shape_cast %64 : vector<2x16x64xbf16> to vector<32x64xbf16>
    %c128 = arith.constant 128 : index
    %c0_51 = arith.constant 0 : index
    %66 = vector.load %arg3[%c128, %c0_51] : memref<1024x128xbf16, #tpu.memory_space<vmem>>, vector<64x128xbf16>
    %cst_52 = arith.constant dense<0.000000e+00> : vector<32x128xf32>
    %67 = tpu.matmul %65, %66, %cst_52 {dimension_numbers = #tpu.dot_dimension_numbers<[1], [0], [0], [1], [0, 0, 1, 1], [], []>} : vector<32x64xbf16>, vector<64x128xbf16>, vector<32x128xf32> -> vector<32x128xf32>
    %68 = arith.addf %60, %67 : vector<32x128xf32>
    %c0_53 = arith.constant 0 : index
    %c16 = arith.constant 16 : index
    %c0_54 = arith.constant 0 : index
    %69 = vector.load %arg6[%c0_53, %c16, %c0_54] : memref<2x80x64xbf16, #tpu.memory_space<vmem>>, vector<2x4x64xbf16>
    %c0_55 = arith.constant 0 : index
    %c36 = arith.constant 36 : index
    %c0_56 = arith.constant 0 : index
    %70 = vector.load %arg6[%c0_55, %c36, %c0_56] : memref<2x80x64xbf16, #tpu.memory_space<vmem>>, vector<2x4x64xbf16>
    %c0_57 = arith.constant 0 : index
    %c56 = arith.constant 56 : index
    %c0_58 = arith.constant 0 : index
    %71 = vector.load %arg6[%c0_57, %c56, %c0_58] : memref<2x80x64xbf16, #tpu.memory_space<vmem>>, vector<2x4x64xbf16>
    %72 = tpu.concatenate %43, %69, %70, %71 in 1 : vector<2x4x64xbf16>, vector<2x4x64xbf16>, vector<2x4x64xbf16>, vector<2x4x64xbf16> -> vector<2x16x64xbf16>
    %73 = vector.shape_cast %72 : vector<2x16x64xbf16> to vector<32x64xbf16>
    %c192 = arith.constant 192 : index
    %c0_59 = arith.constant 0 : index
    %74 = vector.load %arg3[%c192, %c0_59] : memref<1024x128xbf16, #tpu.memory_space<vmem>>, vector<64x128xbf16>
    %cst_60 = arith.constant dense<0.000000e+00> : vector<32x128xf32>
    %75 = tpu.matmul %73, %74, %cst_60 {dimension_numbers = #tpu.dot_dimension_numbers<[1], [0], [0], [1], [0, 0, 1, 1], [], []>} : vector<32x64xbf16>, vector<64x128xbf16>, vector<32x128xf32> -> vector<32x128xf32>
    %76 = arith.addf %68, %75 : vector<32x128xf32>
    %c0_61 = arith.constant 0 : index
    %c0_62 = arith.constant 0 : index
    %c0_63 = arith.constant 0 : index
    %77 = vector.load %arg6[%c0_61, %c0_62, %c0_63] : memref<2x80x64xbf16, #tpu.memory_space<vmem>>, vector<2x4x64xbf16>
    %c0_64 = arith.constant 0 : index
    %c20_65 = arith.constant 20 : index
    %c0_66 = arith.constant 0 : index
    %78 = vector.load %arg6[%c0_64, %c20_65, %c0_66] : memref<2x80x64xbf16, #tpu.memory_space<vmem>>, vector<2x4x64xbf16>
    %c0_67 = arith.constant 0 : index
    %c40_68 = arith.constant 40 : index
    %c0_69 = arith.constant 0 : index
    %79 = vector.load %arg6[%c0_67, %c40_68, %c0_69] : memref<2x80x64xbf16, #tpu.memory_space<vmem>>, vector<2x4x64xbf16>
    %c0_70 = arith.constant 0 : index
    %c60_71 = arith.constant 60 : index
    %c0_72 = arith.constant 0 : index
    %80 = vector.load %arg6[%c0_70, %c60_71, %c0_72] : memref<2x80x64xbf16, #tpu.memory_space<vmem>>, vector<2x4x64xbf16>
    %81 = tpu.concatenate %77, %78, %79, %80 in 1 : vector<2x4x64xbf16>, vector<2x4x64xbf16>, vector<2x4x64xbf16>, vector<2x4x64xbf16> -> vector<2x16x64xbf16>
    %82 = vector.shape_cast %81 : vector<2x16x64xbf16> to vector<32x64xbf16>
    %c256 = arith.constant 256 : index
    %c0_73 = arith.constant 0 : index
    %83 = vector.load %arg3[%c256, %c0_73] : memref<1024x128xbf16, #tpu.memory_space<vmem>>, vector<64x128xbf16>
    %cst_74 = arith.constant dense<0.000000e+00> : vector<32x128xf32>
    %84 = tpu.matmul %82, %83, %cst_74 {dimension_numbers = #tpu.dot_dimension_numbers<[1], [0], [0], [1], [0, 0, 1, 1], [], []>} : vector<32x64xbf16>, vector<64x128xbf16>, vector<32x128xf32> -> vector<32x128xf32>
    %85 = arith.addf %76, %84 : vector<32x128xf32>
    %c0_75 = arith.constant 0 : index
    %c5 = arith.constant 5 : index
    %c0_76 = arith.constant 0 : index
    %86 = vector.load %arg6[%c0_75, %c5, %c0_76] : memref<2x80x64xbf16, #tpu.memory_space<vmem>>, vector<2x4x64xbf16>
    %c0_77 = arith.constant 0 : index
    %c25 = arith.constant 25 : index
    %c0_78 = arith.constant 0 : index
    %87 = vector.load %arg6[%c0_77, %c25, %c0_78] : memref<2x80x64xbf16, #tpu.memory_space<vmem>>, vector<2x4x64xbf16>
    %c0_79 = arith.constant 0 : index
    %c45 = arith.constant 45 : index
    %c0_80 = arith.constant 0 : index
    %88 = vector.load %arg6[%c0_79, %c45, %c0_80] : memref<2x80x64xbf16, #tpu.memory_space<vmem>>, vector<2x4x64xbf16>
    %c0_81 = arith.constant 0 : index
    %c65 = arith.constant 65 : index
    %c0_82 = arith.constant 0 : index
    %89 = vector.load %arg6[%c0_81, %c65, %c0_82] : memref<2x80x64xbf16, #tpu.memory_space<vmem>>, vector<2x4x64xbf16>
    %90 = tpu.concatenate %86, %87, %88, %89 in 1 : vector<2x4x64xbf16>, vector<2x4x64xbf16>, vector<2x4x64xbf16>, vector<2x4x64xbf16> -> vector<2x16x64xbf16>
    %91 = vector.shape_cast %90 : vector<2x16x64xbf16> to vector<32x64xbf16>
    %c320 = arith.constant 320 : index
    %c0_83 = arith.constant 0 : index
    %92 = vector.load %arg3[%c320, %c0_83] : memref<1024x128xbf16, #tpu.memory_space<vmem>>, vector<64x128xbf16>
    %cst_84 = arith.constant dense<0.000000e+00> : vector<32x128xf32>
    %93 = tpu.matmul %91, %92, %cst_84 {dimension_numbers = #tpu.dot_dimension_numbers<[1], [0], [0], [1], [0, 0, 1, 1], [], []>} : vector<32x64xbf16>, vector<64x128xbf16>, vector<32x128xf32> -> vector<32x128xf32>
    %94 = arith.addf %85, %93 : vector<32x128xf32>
    %c0_85 = arith.constant 0 : index
    %c1 = arith.constant 1 : index
    %c0_86 = arith.constant 0 : index
    %95 = vector.load %arg6[%c0_85, %c1, %c0_86] : memref<2x80x64xbf16, #tpu.memory_space<vmem>>, vector<2x4x64xbf16>
    %c0_87 = arith.constant 0 : index
    %c21 = arith.constant 21 : index
    %c0_88 = arith.constant 0 : index
    %96 = vector.load %arg6[%c0_87, %c21, %c0_88] : memref<2x80x64xbf16, #tpu.memory_space<vmem>>, vector<2x4x64xbf16>
    %c0_89 = arith.constant 0 : index
    %c41 = arith.constant 41 : index
    %c0_90 = arith.constant 0 : index
    %97 = vector.load %arg6[%c0_89, %c41, %c0_90] : memref<2x80x64xbf16, #tpu.memory_space<vmem>>, vector<2x4x64xbf16>
    %c0_91 = arith.constant 0 : index
    %c61 = arith.constant 61 : index
    %c0_92 = arith.constant 0 : index
    %98 = vector.load %arg6[%c0_91, %c61, %c0_92] : memref<2x80x64xbf16, #tpu.memory_space<vmem>>, vector<2x4x64xbf16>
    %99 = tpu.concatenate %95, %96, %97, %98 in 1 : vector<2x4x64xbf16>, vector<2x4x64xbf16>, vector<2x4x64xbf16>, vector<2x4x64xbf16> -> vector<2x16x64xbf16>
    %100 = vector.shape_cast %99 : vector<2x16x64xbf16> to vector<32x64xbf16>
    %c384 = arith.constant 384 : index
    %c0_93 = arith.constant 0 : index
    %101 = vector.load %arg3[%c384, %c0_93] : memref<1024x128xbf16, #tpu.memory_space<vmem>>, vector<64x128xbf16>
    %cst_94 = arith.constant dense<0.000000e+00> : vector<32x128xf32>
    %102 = tpu.matmul %100, %101, %cst_94 {dimension_numbers = #tpu.dot_dimension_numbers<[1], [0], [0], [1], [0, 0, 1, 1], [], []>} : vector<32x64xbf16>, vector<64x128xbf16>, vector<32x128xf32> -> vector<32x128xf32>
    %103 = arith.addf %94, %102 : vector<32x128xf32>
    %c0_95 = arith.constant 0 : index
    %c6 = arith.constant 6 : index
    %c0_96 = arith.constant 0 : index
    %104 = vector.load %arg6[%c0_95, %c6, %c0_96] : memref<2x80x64xbf16, #tpu.memory_space<vmem>>, vector<2x4x64xbf16>
    %c0_97 = arith.constant 0 : index
    %c26 = arith.constant 26 : index
    %c0_98 = arith.constant 0 : index
    %105 = vector.load %arg6[%c0_97, %c26, %c0_98] : memref<2x80x64xbf16, #tpu.memory_space<vmem>>, vector<2x4x64xbf16>
    %c0_99 = arith.constant 0 : index
    %c46 = arith.constant 46 : index
    %c0_100 = arith.constant 0 : index
    %106 = vector.load %arg6[%c0_99, %c46, %c0_100] : memref<2x80x64xbf16, #tpu.memory_space<vmem>>, vector<2x4x64xbf16>
    %c0_101 = arith.constant 0 : index
    %c66 = arith.constant 66 : index
    %c0_102 = arith.constant 0 : index
    %107 = vector.load %arg6[%c0_101, %c66, %c0_102] : memref<2x80x64xbf16, #tpu.memory_space<vmem>>, vector<2x4x64xbf16>
    %108 = tpu.concatenate %104, %105, %106, %107 in 1 : vector<2x4x64xbf16>, vector<2x4x64xbf16>, vector<2x4x64xbf16>, vector<2x4x64xbf16> -> vector<2x16x64xbf16>
    %109 = vector.shape_cast %108 : vector<2x16x64xbf16> to vector<32x64xbf16>
    %c448 = arith.constant 448 : index
    %c0_103 = arith.constant 0 : index
    %110 = vector.load %arg3[%c448, %c0_103] : memref<1024x128xbf16, #tpu.memory_space<vmem>>, vector<64x128xbf16>
    %cst_104 = arith.constant dense<0.000000e+00> : vector<32x128xf32>
    %111 = tpu.matmul %109, %110, %cst_104 {dimension_numbers = #tpu.dot_dimension_numbers<[1], [0], [0], [1], [0, 0, 1, 1], [], []>} : vector<32x64xbf16>, vector<64x128xbf16>, vector<32x128xf32> -> vector<32x128xf32>
    %112 = arith.addf %103, %111 : vector<32x128xf32>
    %c0_105 = arith.constant 0 : index
    %c10_106 = arith.constant 10 : index
    %c0_107 = arith.constant 0 : index
    %113 = vector.load %arg6[%c0_105, %c10_106, %c0_107] : memref<2x80x64xbf16, #tpu.memory_space<vmem>>, vector<2x4x64xbf16>
    %c0_108 = arith.constant 0 : index
    %c30_109 = arith.constant 30 : index
    %c0_110 = arith.constant 0 : index
    %114 = vector.load %arg6[%c0_108, %c30_109, %c0_110] : memref<2x80x64xbf16, #tpu.memory_space<vmem>>, vector<2x4x64xbf16>
    %c0_111 = arith.constant 0 : index
    %c50_112 = arith.constant 50 : index
    %c0_113 = arith.constant 0 : index
    %115 = vector.load %arg6[%c0_111, %c50_112, %c0_113] : memref<2x80x64xbf16, #tpu.memory_space<vmem>>, vector<2x4x64xbf16>
    %c0_114 = arith.constant 0 : index
    %c70_115 = arith.constant 70 : index
    %c0_116 = arith.constant 0 : index
    %116 = vector.load %arg6[%c0_114, %c70_115, %c0_116] : memref<2x80x64xbf16, #tpu.memory_space<vmem>>, vector<2x4x64xbf16>
    %117 = tpu.concatenate %113, %114, %115, %116 in 1 : vector<2x4x64xbf16>, vector<2x4x64xbf16>, vector<2x4x64xbf16>, vector<2x4x64xbf16> -> vector<2x16x64xbf16>
    %118 = vector.shape_cast %117 : vector<2x16x64xbf16> to vector<32x64xbf16>
    %c512 = arith.constant 512 : index
    %c0_117 = arith.constant 0 : index
    %119 = vector.load %arg3[%c512, %c0_117] : memref<1024x128xbf16, #tpu.memory_space<vmem>>, vector<64x128xbf16>
    %cst_118 = arith.constant dense<0.000000e+00> : vector<32x128xf32>
    %120 = tpu.matmul %118, %119, %cst_118 {dimension_numbers = #tpu.dot_dimension_numbers<[1], [0], [0], [1], [0, 0, 1, 1], [], []>} : vector<32x64xbf16>, vector<64x128xbf16>, vector<32x128xf32> -> vector<32x128xf32>
    %121 = arith.addf %112, %120 : vector<32x128xf32>
    %c0_119 = arith.constant 0 : index
    %c15_120 = arith.constant 15 : index
    %c0_121 = arith.constant 0 : index
    %122 = vector.load %arg6[%c0_119, %c15_120, %c0_121] : memref<2x80x64xbf16, #tpu.memory_space<vmem>>, vector<2x4x64xbf16>
    %c0_122 = arith.constant 0 : index
    %c35_123 = arith.constant 35 : index
    %c0_124 = arith.constant 0 : index
    %123 = vector.load %arg6[%c0_122, %c35_123, %c0_124] : memref<2x80x64xbf16, #tpu.memory_space<vmem>>, vector<2x4x64xbf16>
    %c0_125 = arith.constant 0 : index
    %c55_126 = arith.constant 55 : index
    %c0_127 = arith.constant 0 : index
    %124 = vector.load %arg6[%c0_125, %c55_126, %c0_127] : memref<2x80x64xbf16, #tpu.memory_space<vmem>>, vector<2x4x64xbf16>
    %c0_128 = arith.constant 0 : index
    %c75 = arith.constant 75 : index
    %c0_129 = arith.constant 0 : index
    %125 = vector.load %arg6[%c0_128, %c75, %c0_129] : memref<2x80x64xbf16, #tpu.memory_space<vmem>>, vector<2x4x64xbf16>
    %126 = tpu.concatenate %122, %123, %124, %125 in 1 : vector<2x4x64xbf16>, vector<2x4x64xbf16>, vector<2x4x64xbf16>, vector<2x4x64xbf16> -> vector<2x16x64xbf16>
    %127 = vector.shape_cast %126 : vector<2x16x64xbf16> to vector<32x64xbf16>
    %c576 = arith.constant 576 : index
    %c0_130 = arith.constant 0 : index
    %128 = vector.load %arg3[%c576, %c0_130] : memref<1024x128xbf16, #tpu.memory_space<vmem>>, vector<64x128xbf16>
    %cst_131 = arith.constant dense<0.000000e+00> : vector<32x128xf32>
    %129 = tpu.matmul %127, %128, %cst_131 {dimension_numbers = #tpu.dot_dimension_numbers<[1], [0], [0], [1], [0, 0, 1, 1], [], []>} : vector<32x64xbf16>, vector<64x128xbf16>, vector<32x128xf32> -> vector<32x128xf32>
    %130 = arith.addf %121, %129 : vector<32x128xf32>
    %c0_132 = arith.constant 0 : index
    %c11_133 = arith.constant 11 : index
    %c0_134 = arith.constant 0 : index
    %131 = vector.load %arg6[%c0_132, %c11_133, %c0_134] : memref<2x80x64xbf16, #tpu.memory_space<vmem>>, vector<2x4x64xbf16>
    %c0_135 = arith.constant 0 : index
    %c31_136 = arith.constant 31 : index
    %c0_137 = arith.constant 0 : index
    %132 = vector.load %arg6[%c0_135, %c31_136, %c0_137] : memref<2x80x64xbf16, #tpu.memory_space<vmem>>, vector<2x4x64xbf16>
    %c0_138 = arith.constant 0 : index
    %c51_139 = arith.constant 51 : index
    %c0_140 = arith.constant 0 : index
    %133 = vector.load %arg6[%c0_138, %c51_139, %c0_140] : memref<2x80x64xbf16, #tpu.memory_space<vmem>>, vector<2x4x64xbf16>
    %c0_141 = arith.constant 0 : index
    %c71 = arith.constant 71 : index
    %c0_142 = arith.constant 0 : index
    %134 = vector.load %arg6[%c0_141, %c71, %c0_142] : memref<2x80x64xbf16, #tpu.memory_space<vmem>>, vector<2x4x64xbf16>
    %135 = tpu.concatenate %131, %132, %133, %134 in 1 : vector<2x4x64xbf16>, vector<2x4x64xbf16>, vector<2x4x64xbf16>, vector<2x4x64xbf16> -> vector<2x16x64xbf16>
    %136 = vector.shape_cast %135 : vector<2x16x64xbf16> to vector<32x64xbf16>
    %c640 = arith.constant 640 : index
    %c0_143 = arith.constant 0 : index
    %137 = vector.load %arg3[%c640, %c0_143] : memref<1024x128xbf16, #tpu.memory_space<vmem>>, vector<64x128xbf16>
    %cst_144 = arith.constant dense<0.000000e+00> : vector<32x128xf32>
    %138 = tpu.matmul %136, %137, %cst_144 {dimension_numbers = #tpu.dot_dimension_numbers<[1], [0], [0], [1], [0, 0, 1, 1], [], []>} : vector<32x64xbf16>, vector<64x128xbf16>, vector<32x128xf32> -> vector<32x128xf32>
    %139 = arith.addf %130, %138 : vector<32x128xf32>
    %c0_145 = arith.constant 0 : index
    %c16_146 = arith.constant 16 : index
    %c0_147 = arith.constant 0 : index
    %140 = vector.load %arg6[%c0_145, %c16_146, %c0_147] : memref<2x80x64xbf16, #tpu.memory_space<vmem>>, vector<2x4x64xbf16>
    %c0_148 = arith.constant 0 : index
    %c36_149 = arith.constant 36 : index
    %c0_150 = arith.constant 0 : index
    %141 = vector.load %arg6[%c0_148, %c36_149, %c0_150] : memref<2x80x64xbf16, #tpu.memory_space<vmem>>, vector<2x4x64xbf16>
    %c0_151 = arith.constant 0 : index
    %c56_152 = arith.constant 56 : index
    %c0_153 = arith.constant 0 : index
    %142 = vector.load %arg6[%c0_151, %c56_152, %c0_153] : memref<2x80x64xbf16, #tpu.memory_space<vmem>>, vector<2x4x64xbf16>
    %c0_154 = arith.constant 0 : index
    %c76 = arith.constant 76 : index
    %c0_155 = arith.constant 0 : index
    %143 = vector.load %arg6[%c0_154, %c76, %c0_155] : memref<2x80x64xbf16, #tpu.memory_space<vmem>>, vector<2x4x64xbf16>
    %144 = tpu.concatenate %140, %141, %142, %143 in 1 : vector<2x4x64xbf16>, vector<2x4x64xbf16>, vector<2x4x64xbf16>, vector<2x4x64xbf16> -> vector<2x16x64xbf16>
    %145 = vector.shape_cast %144 : vector<2x16x64xbf16> to vector<32x64xbf16>
    %c704 = arith.constant 704 : index
    %c0_156 = arith.constant 0 : index
    %146 = vector.load %arg3[%c704, %c0_156] : memref<1024x128xbf16, #tpu.memory_space<vmem>>, vector<64x128xbf16>
    %cst_157 = arith.constant dense<0.000000e+00> : vector<32x128xf32>
    %147 = tpu.matmul %145, %146, %cst_157 {dimension_numbers = #tpu.dot_dimension_numbers<[1], [0], [0], [1], [0, 0, 1, 1], [], []>} : vector<32x64xbf16>, vector<64x128xbf16>, vector<32x128xf32> -> vector<32x128xf32>
    %148 = arith.addf %139, %147 : vector<32x128xf32>
    %c0_158 = arith.constant 0 : index
    %c20_159 = arith.constant 20 : index
    %c0_160 = arith.constant 0 : index
    %149 = vector.load %arg6[%c0_158, %c20_159, %c0_160] : memref<2x80x64xbf16, #tpu.memory_space<vmem>>, vector<2x4x64xbf16>
    %c0_161 = arith.constant 0 : index
    %c40_162 = arith.constant 40 : index
    %c0_163 = arith.constant 0 : index
    %150 = vector.load %arg6[%c0_161, %c40_162, %c0_163] : memref<2x80x64xbf16, #tpu.memory_space<vmem>>, vector<2x4x64xbf16>
    %c0_164 = arith.constant 0 : index
    %c60_165 = arith.constant 60 : index
    %c0_166 = arith.constant 0 : index
    %151 = vector.load %arg6[%c0_164, %c60_165, %c0_166] : memref<2x80x64xbf16, #tpu.memory_space<vmem>>, vector<2x4x64xbf16>
    %152 = tpu.concatenate %149, %150, %151, %43 in 1 : vector<2x4x64xbf16>, vector<2x4x64xbf16>, vector<2x4x64xbf16>, vector<2x4x64xbf16> -> vector<2x16x64xbf16>
    %153 = vector.shape_cast %152 : vector<2x16x64xbf16> to vector<32x64xbf16>
    %c768 = arith.constant 768 : index
    %c0_167 = arith.constant 0 : index
    %154 = vector.load %arg3[%c768, %c0_167] : memref<1024x128xbf16, #tpu.memory_space<vmem>>, vector<64x128xbf16>
    %cst_168 = arith.constant dense<0.000000e+00> : vector<32x128xf32>
    %155 = tpu.matmul %153, %154, %cst_168 {dimension_numbers = #tpu.dot_dimension_numbers<[1], [0], [0], [1], [0, 0, 1, 1], [], []>} : vector<32x64xbf16>, vector<64x128xbf16>, vector<32x128xf32> -> vector<32x128xf32>
    %156 = arith.addf %148, %155 : vector<32x128xf32>
    %c0_169 = arith.constant 0 : index
    %c25_170 = arith.constant 25 : index
    %c0_171 = arith.constant 0 : index
    %157 = vector.load %arg6[%c0_169, %c25_170, %c0_171] : memref<2x80x64xbf16, #tpu.memory_space<vmem>>, vector<2x4x64xbf16>
    %c0_172 = arith.constant 0 : index
    %c45_173 = arith.constant 45 : index
    %c0_174 = arith.constant 0 : index
    %158 = vector.load %arg6[%c0_172, %c45_173, %c0_174] : memref<2x80x64xbf16, #tpu.memory_space<vmem>>, vector<2x4x64xbf16>
    %c0_175 = arith.constant 0 : index
    %c65_176 = arith.constant 65 : index
    %c0_177 = arith.constant 0 : index
    %159 = vector.load %arg6[%c0_175, %c65_176, %c0_177] : memref<2x80x64xbf16, #tpu.memory_space<vmem>>, vector<2x4x64xbf16>
    %160 = tpu.concatenate %157, %158, %159, %43 in 1 : vector<2x4x64xbf16>, vector<2x4x64xbf16>, vector<2x4x64xbf16>, vector<2x4x64xbf16> -> vector<2x16x64xbf16>
    %161 = vector.shape_cast %160 : vector<2x16x64xbf16> to vector<32x64xbf16>
    %c832 = arith.constant 832 : index
    %c0_178 = arith.constant 0 : index
    %162 = vector.load %arg3[%c832, %c0_178] : memref<1024x128xbf16, #tpu.memory_space<vmem>>, vector<64x128xbf16>
    %cst_179 = arith.constant dense<0.000000e+00> : vector<32x128xf32>
    %163 = tpu.matmul %161, %162, %cst_179 {dimension_numbers = #tpu.dot_dimension_numbers<[1], [0], [0], [1], [0, 0, 1, 1], [], []>} : vector<32x64xbf16>, vector<64x128xbf16>, vector<32x128xf32> -> vector<32x128xf32>
    %164 = arith.addf %156, %163 : vector<32x128xf32>
    %c0_180 = arith.constant 0 : index
    %c21_181 = arith.constant 21 : index
    %c0_182 = arith.constant 0 : index
    %165 = vector.load %arg6[%c0_180, %c21_181, %c0_182] : memref<2x80x64xbf16, #tpu.memory_space<vmem>>, vector<2x4x64xbf16>
    %c0_183 = arith.constant 0 : index
    %c41_184 = arith.constant 41 : index
    %c0_185 = arith.constant 0 : index
    %166 = vector.load %arg6[%c0_183, %c41_184, %c0_185] : memref<2x80x64xbf16, #tpu.memory_space<vmem>>, vector<2x4x64xbf16>
    %c0_186 = arith.constant 0 : index
    %c61_187 = arith.constant 61 : index
    %c0_188 = arith.constant 0 : index
    %167 = vector.load %arg6[%c0_186, %c61_187, %c0_188] : memref<2x80x64xbf16, #tpu.memory_space<vmem>>, vector<2x4x64xbf16>
    %168 = tpu.concatenate %165, %166, %167, %43 in 1 : vector<2x4x64xbf16>, vector<2x4x64xbf16>, vector<2x4x64xbf16>, vector<2x4x64xbf16> -> vector<2x16x64xbf16>
    %169 = vector.shape_cast %168 : vector<2x16x64xbf16> to vector<32x64xbf16>
    %c896 = arith.constant 896 : index
    %c0_189 = arith.constant 0 : index
    %170 = vector.load %arg3[%c896, %c0_189] : memref<1024x128xbf16, #tpu.memory_space<vmem>>, vector<64x128xbf16>
    %cst_190 = arith.constant dense<0.000000e+00> : vector<32x128xf32>
    %171 = tpu.matmul %169, %170, %cst_190 {dimension_numbers = #tpu.dot_dimension_numbers<[1], [0], [0], [1], [0, 0, 1, 1], [], []>} : vector<32x64xbf16>, vector<64x128xbf16>, vector<32x128xf32> -> vector<32x128xf32>
    %172 = arith.addf %164, %171 : vector<32x128xf32>
    %c0_191 = arith.constant 0 : index
    %c26_192 = arith.constant 26 : index
    %c0_193 = arith.constant 0 : index
    %173 = vector.load %arg6[%c0_191, %c26_192, %c0_193] : memref<2x80x64xbf16, #tpu.memory_space<vmem>>, vector<2x4x64xbf16>
    %c0_194 = arith.constant 0 : index
    %c46_195 = arith.constant 46 : index
    %c0_196 = arith.constant 0 : index
    %174 = vector.load %arg6[%c0_194, %c46_195, %c0_196] : memref<2x80x64xbf16, #tpu.memory_space<vmem>>, vector<2x4x64xbf16>
    %c0_197 = arith.constant 0 : index
    %c66_198 = arith.constant 66 : index
    %c0_199 = arith.constant 0 : index
    %175 = vector.load %arg6[%c0_197, %c66_198, %c0_199] : memref<2x80x64xbf16, #tpu.memory_space<vmem>>, vector<2x4x64xbf16>
    %176 = tpu.concatenate %173, %174, %175, %43 in 1 : vector<2x4x64xbf16>, vector<2x4x64xbf16>, vector<2x4x64xbf16>, vector<2x4x64xbf16> -> vector<2x16x64xbf16>
    %177 = vector.shape_cast %176 : vector<2x16x64xbf16> to vector<32x64xbf16>
    %c960 = arith.constant 960 : index
    %c0_200 = arith.constant 0 : index
    %178 = vector.load %arg3[%c960, %c0_200] : memref<1024x128xbf16, #tpu.memory_space<vmem>>, vector<64x128xbf16>
    %cst_201 = arith.constant dense<0.000000e+00> : vector<32x128xf32>
    %179 = tpu.matmul %177, %178, %cst_201 {dimension_numbers = #tpu.dot_dimension_numbers<[1], [0], [0], [1], [0, 0, 1, 1], [], []>} : vector<32x64xbf16>, vector<64x128xbf16>, vector<32x128xf32> -> vector<32x128xf32>
    %180 = arith.addf %172, %179 : vector<32x128xf32>
    %cst_202 = arith.constant 0.000000e+00 : f32
    %181 = vector.broadcast %cst_202 : f32 to vector<32x128xf32>
    %182 = arith.cmpf oge, %180, %181 : vector<32x128xf32>
    %cst_203 = arith.constant 2.000000e-01 : f32
    %183 = vector.broadcast %cst_203 : f32 to vector<32x128xf32>
    %184 = arith.mulf %183, %180 : vector<32x128xf32>
    %185 = arith.select %182, %180, %184 : vector<32x128xi1>, vector<32x128xf32>
    %186 = vector.shape_cast %185 : vector<32x128xf32> to vector<2x16x128xf32>
    %c0_204 = arith.constant 0 : index
    %c0_205 = arith.constant 0 : index
    %187 = vector.load %arg4[%c0_204, %c0_205] : memref<16x128xf32, #tpu.memory_space<vmem>>, vector<16x128xf32>
    %188 = vector.shape_cast %187 : vector<16x128xf32> to vector<1x16x128xf32>
    %189 = vector.broadcast %188 : vector<1x16x128xf32> to vector<2x16x128xf32>
    %190 = arith.mulf %186, %189 : vector<2x16x128xf32>
    %cst_206 = arith.constant dense<0.000000e+00> : vector<2x16xf32>
    %191 = vector.multi_reduction <add>, %190, %cst_206 [2] : vector<2x16x128xf32> to vector<2x16xf32>
    %cst_207 = arith.constant dense<0.000000e+00> : vector<2xf32>
    %192 = vector.multi_reduction <add>, %191, %cst_207 [1] : vector<2x16xf32> to vector<2xf32>
    %193 = vector.shape_cast %192 : vector<2xf32> to vector<2x1xf32>
    %c0_208 = arith.constant 0 : index
    %c0_209 = arith.constant 0 : index
    %194 = vector.load %arg5[%c0_208, %c0_209] : memref<2x1xf32, #tpu.memory_space<vmem>>, vector<2x1xf32>
    tpu.vector_store %arg5[%c0_208, %c0_209], %193 {strides = array<i32>} : memref<2x1xf32, #tpu.memory_space<vmem>>, vector<2x1xf32>,
    return
  }
  func.func @transform_0(%arg0: i32) -> (i32, i32) {
    %c0_i32 = arith.constant 0 : i32
    %c0_i32_0 = arith.constant 0 : i32
    return %arg0, %c0_i32 : i32, i32
  }
  func.func @transform_1(%arg0: i32) -> (i32, i32) {
    %c0_i32 = arith.constant 0 : i32
    %c0_i32_0 = arith.constant 0 : i32
    %c0_i32_1 = arith.constant 0 : i32
    return %c0_i32, %c0_i32_0 : i32, i32
  }
  func.func @transform_2(%arg0: i32) -> (i32, i32) {
    %c0_i32 = arith.constant 0 : i32
    %c0_i32_0 = arith.constant 0 : i32
    %c0_i32_1 = arith.constant 0 : i32
    return %c0_i32, %c0_i32_0 : i32, i32
  }
  func.func @transform_3(%arg0: i32) -> (i32, i32) {
    %c0_i32 = arith.constant 0 : i32
    %c0_i32_0 = arith.constant 0 : i32
    %c0_i32_1 = arith.constant 0 : i32
    return %c0_i32, %c0_i32_0 : i32, i32
  }
  func.func @transform_4(%arg0: i32) -> (i32, i32) {
    %c0_i32 = arith.constant 0 : i32
    %c0_i32_0 = arith.constant 0 : i32
    return %arg0, %c0_i32 : i32, i32
  }
}

</mosaic_0001>

<bundles_post_ra>
// kernel: wgan_discriminator_forward.1
= control target key start
LH: loop header
LB: loop body
LE: loop exit
PB: predicated region body
PF: predicated region fallthrough
CT: control target
= control target key end

     0   :  { %vm82_vm0 = vcmask 130048   ;;  %vm252_vm2 = vcmask 1040384   ;;  %vm253_vm4 = vsmask.f32 256  ;;  %vm257_vm5 = vcmask 1042432   ;;  %s4071_s1 = inlined_call_operand.vmem [shape: bf16[16,64], index: 1, kind: input, shape index: {}]   ;;  %s4072_s0 = inlined_call_operand.vmem [shape: bf16[128,16], index: 0, kind: input, shape index: {}]   ;;  %s4073_s2 = inlined_call_operand.vmem [shape: bf16[1024,128], index: 2, kind: input, shape index: {}]   ;;  %s4074_s3 = inlined_call_operand.vmem [shape: f32[16,128], index: 3, kind: input, shape index: {}]   ;;  %s4075_s4 = inlined_call_operand.vmem [shape: f32[2,1], index: 4, kind: output, shape index: {}]  }
   0x1   :  { %v2935_v0 = vld [vmem:[%s4071_s1] sm:$0xff]  ;;  %v2928_v2 = vld [vmem:[%s4072_s0 + $0x8] sm:$0xff]  ;;  %v2929_v3 = vld [vmem:[%s4072_s0 + $0x10] sm:$0xff]  ;;  %vm258_vm6 = vsmask.f32 2304  ;;  %vm262_vm7 = vcmask 1044480  }
   0x2   :  { %v2927_v1 = vld [vmem:[%s4072_s0] sm:$0xff]  ;;  %114 = vmatpush.bf16.msra.mxu0 %v2935_v0  ;;  %v2930_v4 = vld [vmem:[%s4072_s0 + $0x18] sm:$0xff]  ;;  %v2932_v6 = vld [vmem:[%s4072_s0 + $0x28] sm:$0xff]  ;;  %vm263_vm8 = vsmask.f32 4352  ;;  %vm281_vm13 = vcmask 519168  }
   0x3   :  { %v2931_v5 = vld [vmem:[%s4072_s0 + $0x20] sm:$0xff]  ;;  %v2933_v7 = vld [vmem:[%s4072_s0 + $0x30] sm:$0xff]  ;;  %v2934_v8 = vld [vmem:[%s4072_s0 + $0x38] sm:$0xff]  ;;  %vm4079_vm14 = vcmask 516096  }
   0x4   :  { %vm3059_vm9 = vmand %vm252_vm2, %vm253_vm4 }
   0x5   :  { %2615 = vmatmul.msk.bf16.vlgmr.msra.gmra.mxu0 %vm82_vm0, %v2927_v1  ;;  %vm3064_vm10 = vmand %vm257_vm5, %vm258_vm6 }
   0x6   :  { %vm3068_vm11 = vmand %vm262_vm7, %vm263_vm8  ;;  %vm404_vm7 = vcmask 1045508   ;;  %vm418_vm8 = vcmask 519170  }
  0x15   :  { %2616 = vmatmul.msk.bf16.gmra.mxu0 %vm82_vm0, %v2928_v2 }
  0x25   :  { %2617 = vmatmul.msk.bf16.gmra.mxu0 %vm82_vm0, %v2929_v3 }
  0x35   :  { %2618 = vmatmul.msk.bf16.gmra.mxu0 %vm82_vm0, %v2930_v4 }
  0x45   :  { %2619 = vmatmul.msk.bf16.gmra.mxu0 %vm82_vm0, %v2931_v5 }
  0x55   :  { %2620 = vmatmul.msk.bf16.gmra.mxu0 %vm82_vm0, %v2932_v6 }
  0x65   :  { %2621 = vmatmul.msk.bf16.gmra.mxu0 %vm82_vm0, %v2933_v7 }
  0x75   :  { %2622 = vmatmul.msk.bf16.gmra.mxu0 %vm82_vm0, %v2934_v8  ;;  %vm335_vm0 = vcmask 1044484  }
  0x76   :  { %vm3088_vm4 = vmor %vm252_vm2, %vm335_vm0  ;;  %vm403_vm2 = vcmask 1041408  }
  0x82   :  { %v116_v9 = vpop.f32.mrf.mxu0 }
  0x83   :  { %vm156_vm1 = vcmp.ge.f32.partialorder %v116_v9, 0.0  ;;  %v172_v10 = vmul.f32 0.2, %v116_v9 }
  0x85   :  { %v188_v11 = vsel %vm156_vm1, %v116_v9, %v172_v10  ;;  %vm4078_vm1 = vcmask 519169  }
  0x86   :  { %v204_v12 = vpack.c.bf16 %v188_v11, %v188_v11 }
  0x88   :  { %v222_v13 = vunpack.c.l.b16 %v204_v12 }
  0x8a   :  { %v224_v14 = vpack.c.b16 %v222_v13, %v222_v13  ;;  %v118_v15 = vpop.f32.mrf.mxu0 }
  0x8b   :  { %vm157_vm3 = vcmp.ge.f32.partialorder %v118_v15, 0.0  ;;  %v173_v16 = vmul.f32 0.2, %v118_v15 }
  0x8c   :  { %v227_v17 = vshrl.u32 %v224_v14, 16  ;;  %v230_v18 = vshll.u32 %v224_v14, 16 }
  0x8d   :  { %v189_v19 = vsel %vm157_vm3, %v118_v15, %v173_v16  ;;  %vm4077_vm3 = vcmask 517120  }
  0x8e   :  { %v229_v20 = vrot.slane %v227_v17, 1  ;;  %v232_v21 = vrot.slane %v230_v18, 2  ;;  %v244_v22 = vrot.slane %v227_v17, 5  ;;  %v245_v23 = vrot.slane %v230_v18, 6  ;;  %v2939_v17 = vld [vmem:[%s4073_s2 + $0x18] sm:$0xff] }
  0x8f   :  { %v205_v25 = vpack.c.bf16 %v189_v19, %v189_v19  ;;  %983 = vmatpush.bf16.msra.mxu2 %v2939_v17 }
  0x90   :  { %v233_v26 = vor.u32 %v232_v21, %v229_v20  ;;  %v246_v27 = vor.u32 %v245_v23, %v244_v22 }
  0x91   :  { %v289_v30 = vunpack.c.l.b16 %v205_v25 }
  0x92   :  { %v255_v31 = vsel %vm3059_vm9, 0, %v233_v26  ;;  %v121_v32 = vpop.f32.mrf.mxu0 }
  0x93   :  { %v260_v33 = vsel %vm3064_vm10, %v255_v31, %v246_v27  ;;  %v291_v34 = vpack.c.b16 %v289_v30, %v289_v30  ;;  %vm158_vm12 = vcmp.ge.f32.partialorder %v121_v32, 0.0  ;;  %v174_v35 = vmul.f32 0.2, %v121_v32 }
  0x94   :  { %v265_v36 = vsel %vm3068_vm11, %v260_v33, 0 }
  0x95   :  { %v269_v37 = vunpack.c.l.b16 %v265_v36  ;;  %v270_v38 = vunpack.c.h.b16 %v265_v36  ;;  %v294_v39 = vshrl.u32 %v291_v34, 16  ;;  %v297_v40 = vshll.u32 %v291_v34, 16  ;;  %v2947_v36 = vld [vmem:[%s4073_s2 + $0x58] sm:$0xff] }
  0x96   :  { %v190_v41 = vsel %vm158_vm12, %v121_v32, %v174_v35  ;;  %v2938_v35 = vld [vmem:[%s4073_s2 + $0x10] sm:$0xff]  ;;  %vm4076_vm12 = vcmask 518144   ;;  %1118 = vmatpush.bf16.msra.mxu3 %v2947_v36 }
  0x97   :  { %v273_v42 = vpack.c.b16 %v269_v37, %v269_v37  ;;  %v274_v43 = vpack.c.b16 %v270_v38, %v270_v38  ;;  %v296_v44 = vrot.slane %v294_v39, 1  ;;  %v299_v45 = vrot.slane %v297_v40, 2  ;;  %984 = vmatpush.bf16.msra.mxu2 %v2938_v35 }
  0x98   :  { %v311_v46 = vrot.slane %v294_v39, 5  ;;  %v312_v47 = vrot.slane %v297_v40, 6  ;;  %v206_v48 = vpack.c.bf16 %v190_v41, %v190_v41 }
  0x99   :  { %282 = vst.msk [vmem:[#allocation2] sm:$0xf] %vm281_vm13, %v273_v42  ;;  %v300_v49 = vor.u32 %v299_v45, %v296_v44  ;;  %v2943_v45 = vld [vmem:[%s4073_s2 + $0x38] sm:$0xff] }
  0x9a   :  { %284 = vst.msk [vmem:[#allocation2 + $0x4] sm:$0x1] %vm4079_vm14, %v274_v43  ;;  %v313_v50 = vor.u32 %v312_v47, %v311_v46  ;;  %v357_v51 = vunpack.c.l.b16 %v206_v48  ;;  %v123_v52 = vpop.f32.mrf.mxu0  ;;  %936 = vmatpush.bf16.msra.mxu1 %v2943_v45 }
  0x9b   :  { %v319_v53 = vsel %vm3059_vm9, 0, %v300_v49  ;;  %vm159_vm15 = vcmp.ge.f32.partialorder %v123_v52, 0.0  ;;  %v175_v54 = vmul.f32 0.2, %v123_v52 }
  0x9c   :  { %v321_v55 = vsel %vm3064_vm10, %v319_v53, %v313_v50  ;;  %v359_v56 = vpack.c.b16 %v357_v51, %v357_v51  ;;  %v2937_v51 = vld [vmem:[%s4073_s2 + $0x8] sm:$0xff] }
  0x9d   :  { %v323_v57 = vsel %vm3068_vm11, %v321_v55, 0  ;;  %v191_v58 = vsel %vm159_vm15, %v123_v52, %v175_v54  ;;  %vm472_vm15 = vcmask 1046532   ;;  %v2946_v52 = vld [vmem:[%s4073_s2 + $0x50] sm:$0xff]  ;;  %985 = vmatpush.bf16.msra.mxu2 %v2937_v51 }
  0x9e   :  { %v327_v59 = vunpack.c.l.b16 %v323_v57  ;;  %v328_v60 = vunpack.c.h.b16 %v323_v57  ;;  %v362_v61 = vshrl.u32 %v359_v56, 16  ;;  %v365_v62 = vshll.u32 %v359_v56, 16  ;;  %v2991_v56 = vld [vmem:[%s4073_s2 + $0x198] sm:$0xff]  ;;  %1119 = vmatpush.bf16.msra.mxu3 %v2946_v52 }
  0x9f   :  { %v207_v63 = vpack.c.bf16 %v191_v58, %v191_v58  ;;  %2256 = vmatpush.bf16.msrb.mxu0 %v2991_v56 }
  0xa0   :  { %v331_v0 = vpack.c.b16 %v327_v59, %v327_v59  ;;  %v332_v1 = vpack.c.b16 %v328_v60, %v328_v60  ;;  %v364_v2 = vrot.slane %v362_v61, 1  ;;  %v367_v3 = vrot.slane %v365_v62, 2 }
  0xa1   :  { %v379_v4 = vrot.slane %v362_v61, 5  ;;  %v380_v5 = vrot.slane %v365_v62, 6  ;;  %v426_v6 = vunpack.c.l.b16 %v207_v63 }
  0xa2   :  { %v337_v7 = vrot.slane %v331_v0, 7  ;;  %v368_v8 = vor.u32 %v367_v3, %v364_v2  ;;  %v126_v9 = vpop.f32.mrf.mxu0  ;;  %v339_v15 = vrot.slane %v332_v1, 7  ;;  %v2942_v3 = vld [vmem:[%s4073_s2 + $0x30] sm:$0xff] }
  0xa3   :  { %v381_v11 = vor.u32 %v380_v5, %v379_v4  ;;  %v428_v12 = vpack.c.b16 %v426_v6, %v426_v6  ;;  %vm160_vm6 = vcmp.ge.f32.partialorder %v126_v9, 0.0  ;;  %v176_v13 = vmul.f32 0.2, %v126_v9  ;;  %937 = vmatpush.bf16.msra.mxu1 %v2942_v3 }
  0xa4   :  { %v338_v14 = vrot.slane %v337_v7, 4  ;;  %350 = vst.msk [vmem:[#allocation2 + $0x4] sm:$0xe] %vm4078_vm1, %v337_v7  ;;  %v387_v16 = vsel %vm3059_vm9, 0, %v368_v8  ;;  %v2936_v8 = vld [vmem:[%s4073_s2] sm:$0xff] }
  0xa5   :  { %v389_v18 = vsel %vm3064_vm10, %v387_v16, %v381_v11  ;;  %v431_v19 = vshrl.u32 %v428_v12, 16  ;;  %v434_v20 = vshll.u32 %v428_v12, 16  ;;  %v192_v21 = vsel %vm160_vm6, %v126_v9, %v176_v13  ;;  %vm3117_vm6 = vmor %vm403_vm2, %vm404_vm7  ;;  %v2945_v9 = vld [vmem:[%s4073_s2 + $0x48] sm:$0xff]  ;;  %v2990_v12 = vld [vmem:[%s4073_s2 + $0x190] sm:$0xff]  ;;  %986 = vmatpush.bf16.msra.mxu2 %v2936_v8 }
  0xa6   :  { %v340_v22 = vsel %vm3088_vm4, %v338_v14, %v339_v15  ;;  %v391_v23 = vsel %vm3068_vm11, %v389_v18, 0  ;;  %v208_v25 = vpack.c.bf16 %v192_v21, %v192_v21  ;;  %vm486_vm7 = vcmask 519171   ;;  %1120 = vmatpush.bf16.msra.mxu3 %v2945_v9  ;;  %2257 = vmatpush.bf16.msrb.mxu0 %v2990_v12 }
  0xa7   :  { %352 = vst.msk [vmem:[#allocation2 + $0x8] sm:$0x3] %vm4077_vm3, %v340_v22  ;;  %v395_v26 = vunpack.c.l.b16 %v391_v23  ;;  %v396_v27 = vunpack.c.h.b16 %v391_v23  ;;  %v433_v30 = vrot.slane %v431_v19, 1  ;;  %v436_v31 = vrot.slane %v434_v20, 2  ;;  %v2941_v22 = vld [vmem:[%s4073_s2 + $0x28] sm:$0xff] }
  0xa8   :  { %v448_v32 = vrot.slane %v431_v19, 5  ;;  %v449_v33 = vrot.slane %v434_v20, 6  ;;  %v493_v34 = vunpack.c.l.b16 %v208_v25  ;;  %938 = vmatpush.bf16.msra.mxu1 %v2941_v22 }
  0xa9   :  { %v399_v37 = vpack.c.b16 %v395_v26, %v395_v26  ;;  %v400_v38 = vpack.c.b16 %v396_v27, %v396_v27  ;;  %v437_v39 = vor.u32 %v436_v31, %v433_v30 }
  0xaa   :  { %v450_v40 = vor.u32 %v449_v33, %v448_v32  ;;  %v495_v41 = vpack.c.b16 %v493_v34, %v493_v34  ;;  %v128_v42 = vpop.f32.mrf.mxu0 }
  0xab   :  { %v406_v43 = vrot.slane %v399_v37, 6  ;;  %v456_v44 = vsel %vm3059_vm9, 0, %v437_v39  ;;  %vm161_vm0 = vcmp.ge.f32.partialorder %v128_v42, 0.0  ;;  %v177_v50 = vmul.f32 0.2, %v128_v42 }
  0xac   :  { %v458_v47 = vsel %vm3064_vm10, %v456_v44, %v450_v40  ;;  %v498_v48 = vshrl.u32 %v495_v41, 16  ;;  %v501_v49 = vshll.u32 %v495_v41, 16  ;;  %v408_v54 = vrot.slane %v400_v38, 6  ;;  %v739_v61 = vld [vmem:[#allocation2 + $0x4] sm:$0x6] }
  0xad   :  { %v407_v53 = vrot.slane %v406_v43, 4  ;;  %419 = vst.msk [vmem:[#allocation2 + $0x8] sm:$0xc] %vm418_vm8, %v406_v43  ;;  %v460_v55 = vsel %vm3068_vm11, %v458_v47, 0  ;;  %v998_v62 = vld [vmem:[#allocation2 + $0x4] sm:$0xe]  ;;  %v193_v2 = vsel %vm161_vm0, %v128_v42, %v177_v50  ;;  %v749_v13 = vunpack.c.l.b16 %v739_v61  ;;  %vm3155_vm0 = vmor %vm257_vm5, %vm472_vm15 }
  0xae   :  { %v464_v57 = vunpack.c.l.b16 %v460_v55  ;;  %v465_v58 = vunpack.c.h.b16 %v460_v55  ;;  %v500_v59 = vrot.slane %v498_v48, 1  ;;  %v503_v60 = vrot.slane %v501_v49, 2  ;;  %v2944_v55 = vld [vmem:[%s4073_s2 + $0x40] sm:$0xff]  ;;  %v800_v56 = vld [vmem:[#allocation2 + $0x8] sm:$0x3] }
  0xaf   :  { %v409_v63 = vsel %vm3117_vm6, %v407_v53, %v408_v54  ;;  %v515_v0 = vrot.slane %v498_v48, 5  ;;  %v516_v1 = vrot.slane %v501_v49, 6  ;;  %v209_v7 = vpack.c.bf16 %v193_v2, %v193_v2  ;;  %v3176_v48 = vld [vmem:[#allocation2 + $0x4] sm:$0x8]  ;;  %1121 = vmatpush.bf16.msra.mxu3 %v2944_v55 }
  0xb0   :  { %421 = vst.msk [vmem:[#allocation2 + $0xc] sm:$0x7] %vm4076_vm12, %v409_v63  ;;  %v468_v4 = vpack.c.b16 %v464_v57, %v464_v57  ;;  %v469_v5 = vpack.c.b16 %v465_v58, %v465_v58  ;;  %v504_v6 = vor.u32 %v503_v60, %v500_v59  ;;  %v1006_v14 = vunpack.c.l.b16 %v998_v62  ;;  %v2989_v59 = vld [vmem:[%s4073_s2 + $0x188] sm:$0xff] }
  0xb1   :  { %v517_v11 = vor.u32 %v516_v1, %v515_v0  ;;  %v549_v17 = vunpack.c.l.b16 %v209_v7  ;;  %v3164_v23 = vpack.c.b16 %v749_v13, %v749_v13  ;;  %v813_v61 = vunpack.c.l.b16 %v3176_v48  ;;  %2258 = vmatpush.bf16.msrb.mxu0 %v2989_v59 }
  0xb2   :  { %v474_v15 = vrot.slane %v468_v4, 5  ;;  %v523_v16 = vsel %vm3059_vm9, 0, %v504_v6  ;;  %v131_v18 = vpop.f32.mrf.mxu0  ;;  %v476_v26 = vrot.slane %v469_v5, 5  ;;  %v3169_v34 = vpack.c.b16 %v1006_v14, %v1006_v14  ;;  %v2940_v6 = vld [vmem:[%s4073_s2 + $0x20] sm:$0xff] }
  0xb3   :  { %v525_v20 = vsel %vm3064_vm10, %v523_v16, %v517_v11  ;;  %vm162_vm12 = vcmp.ge.f32.partialorder %v131_v18, 0.0  ;;  %v178_v21 = vmul.f32 0.2, %v131_v18  ;;  %v551_v30 = vpack.c.b16 %v549_v17, %v549_v17  ;;  %939 = vmatpush.bf16.msra.mxu1 %v2940_v6 }
  0xb4   :  { %v475_v25 = vrot.slane %v474_v15, 4  ;;  %487 = vst.msk [vmem:[#allocation2 + $0xc] sm:$0x8] %vm486_vm7, %v474_v15  ;;  %v527_v27 = vsel %vm3068_vm11, %v525_v20, 0  ;;  %v753_v41 = vrot.slane %v3164_v23, 7  ;;  %v1011_v52 = vshrl.u32 %v3169_v34, 16 }
  0xb5   :  { %v531_v31 = vunpack.c.l.b16 %v527_v27  ;;  %v532_v32 = vunpack.c.h.b16 %v527_v27  ;;  %v194_v33 = vsel %vm162_vm12, %v131_v18, %v178_v21  ;;  %v554_v36 = vshrl.u32 %v551_v30, 16 }
  0xb6   :  { %v477_v35 = vsel %vm3155_vm0, %v475_v25, %v476_v26  ;;  %v557_v37 = vshll.u32 %v551_v30, 16  ;;  %v210_v38 = vpack.c.bf16 %v194_v33, %v194_v33  ;;  %v3186_v58 = vsel %vm403_vm2, 0, %v753_v41 }
  0xb7   :  { %488 = vst.msk [vmem:[#allocation2 + $0x10] sm:$0xf] %vm281_vm13, %v477_v35  ;;  %v535_v39 = vpack.c.b16 %v531_v31, %v531_v31  ;;  %v536_v40 = vpack.c.b16 %v532_v32, %v532_v32  ;;  %v556_v42 = vrot.slane %v554_v36, 1  ;;  %v571_v44 = vrot.slane %v554_v36, 5 }
  0xb8   :  { %v559_v43 = vrot.slane %v557_v37, 2  ;;  %v572_v45 = vrot.slane %v557_v37, 6  ;;  %v613_v47 = vunpack.c.l.b16 %v210_v38  ;;  %v1014_v60 = vshll.u32 %v3169_v34, 16 }
  0xb9   :  { %543 = vst.msk [vmem:[#allocation2 + $0x14] sm:$0xf] %vm281_vm13, %v535_v39  ;;  %v1013_v7 = vrot.slane %v1011_v52, 7  ;;  %v3200_v8 = vunpack.c.l.b16 %v800_v56  ;;  %v3206_v32 = vrot.slane %v1011_v52, 1  ;;  %vm781_vm15 = vcmask 1043456  }
  0xba   :  { %544 = vst.msk [vmem:[#allocation2 + $0x18] sm:$0x1] %vm4079_vm14, %v536_v40  ;;  %v560_v49 = vor.u32 %v559_v43, %v556_v42  ;;  %v573_v50 = vor.u32 %v572_v45, %v571_v44  ;;  %v133_v51 = vpop.f32.mrf.mxu0  ;;  %v615_v53 = vpack.c.b16 %v613_v47, %v613_v47 }
  0xbb   :  { %vm163_vm5 = vcmp.ge.f32.partialorder %v133_v51, 0.0  ;;  %v179_v54 = vmul.f32 0.2, %v133_v51  ;;  %v741_v2 = vld [vmem:[#allocation2 + $0xc] sm:$0x8]  ;;  %v3204_v31 = vor.u32 %v1014_v60, %v1013_v7 }
  0xbc   :  { %v579_v57 = vsel %vm3059_vm9, 0, %v560_v49  ;;  %v618_v63 = vshrl.u32 %v615_v53, 16  ;;  %v621_v0 = vshll.u32 %v615_v53, 16  ;;  %v759_v17 = vunpack.c.l.b16 %v741_v2 }
  0xbd   :  { %v581_v62 = vsel %vm3064_vm10, %v579_v57, %v573_v50  ;;  %v195_v1 = vsel %vm163_vm5, %v133_v51, %v179_v54  ;;  %vm786_vm5 = vcmask 1045504  }
  0xbe   :  { %v583_v3 = vsel %vm3068_vm11, %v581_v62, 0  ;;  %v211_v4 = vpack.c.bf16 %v195_v1, %v195_v1  ;;  %v742_v5 = vld [vmem:[#allocation2 + $0x10] sm:$0x1]  ;;  %v620_v12 = vrot.slane %v618_v63, 1  ;;  %v623_v13 = vrot.slane %v621_v0, 2 }
  0xbf   :  { %v587_v9 = vunpack.c.l.b16 %v583_v3  ;;  %v588_v11 = vunpack.c.h.b16 %v583_v3  ;;  %v635_v14 = vrot.slane %v618_v63, 5  ;;  %v636_v15 = vrot.slane %v621_v0, 6  ;;  %v1000_v18 = vld [vmem:[#allocation2 + $0x10] sm:$0x3] }
  0xc0   :  { %v677_v16 = vunpack.c.l.b16 %v211_v4  ;;  %v624_v22 = vor.u32 %v623_v13, %v620_v12  ;;  %v760_v25 = vunpack.c.l.b16 %v742_v5  ;;  %v1026_v36 = vunpack.c.l.b16 %v1000_v18 }
  0xc1   :  { %v591_v20 = vpack.c.b16 %v587_v9, %v587_v9  ;;  %v592_v21 = vpack.c.b16 %v588_v11, %v588_v11  ;;  %v637_v26 = vor.u32 %v636_v15, %v635_v14  ;;  %v3226_v1 = vrot.slane %v1014_v60, 2 }
  0xc2   :  { %v679_v27 = vpack.c.b16 %v677_v16, %v677_v16  ;;  %v136_v30 = vpop.f32.mrf.mxu0  ;;  %v643_v35 = vsel %vm3059_vm9, 0, %v624_v22  ;;  %v3215_v44 = vpack.c.b16 %v760_v25, %v759_v17  ;;  %v3222_v0 = vpack.c.b16 %v1026_v36, %v759_v17 }
  0xc3   :  { %v595_v33 = vrot.slane %v591_v20, 7  ;;  %vm164_vm12 = vcmp.ge.f32.partialorder %v136_v30, 0.0  ;;  %v645_v37 = vsel %vm3064_vm10, %v643_v35, %v637_v26  ;;  %v180_v40 = vmul.f32 0.2, %v136_v30 }
  0xc4   :  { %v682_v38 = vshrl.u32 %v679_v27, 16  ;;  %v685_v39 = vshll.u32 %v679_v27, 16  ;;  %v597_v42 = vrot.slane %v592_v21, 7  ;;  %v647_v43 = vsel %vm3068_vm11, %v645_v37, 0 }
  0xc5   :  { %v596_v41 = vrot.slane %v595_v33, 4  ;;  %607 = vst.msk [vmem:[#allocation2 + $0x18] sm:$0xe] %vm4078_vm1, %v595_v33  ;;  %v651_v45 = vunpack.c.l.b16 %v647_v43  ;;  %v652_v47 = vunpack.c.h.b16 %v647_v43  ;;  %v196_v54 = vsel %vm164_vm12, %v136_v30, %v180_v40  ;;  %v2988_v33 = vld [vmem:[%s4073_s2 + $0x180] sm:$0xff] }
  0xc6   :  { %v684_v49 = vrot.slane %v682_v38, 1  ;;  %v687_v50 = vrot.slane %v685_v39, 2  ;;  %v699_v52 = vrot.slane %v682_v38, 5  ;;  %v700_v53 = vrot.slane %v685_v39, 6  ;;  %2259 = vmatpush.bf16.msrb.mxu0 %v2988_v33 }
  0xc7   :  { %v598_v51 = vsel %vm3088_vm4, %v596_v41, %v597_v42  ;;  %v655_v55 = vpack.c.b16 %v651_v45, %v651_v45  ;;  %v656_v56 = vpack.c.b16 %v652_v47, %v652_v47  ;;  %v212_v59 = vpack.c.bf16 %v196_v54, %v196_v54 }
  0xc8   :  { %608 = vst.msk [vmem:[#allocation2 + $0x1c] sm:$0x3] %vm4077_vm3, %v598_v51  ;;  %v688_v57 = vor.u32 %v687_v50, %v684_v49  ;;  %v701_v62 = vor.u32 %v700_v53, %v699_v52  ;;  %v765_v63 = vrot.slane %v3215_v44, 7  ;;  %vm927_vm12 = vcmask 523264  }
  0xc9   :  { %v659_v2 = vrot.slane %v655_v55, 6  ;;  %v661_v3 = vrot.slane %v656_v56, 6  ;;  %v223_v5 = vunpack.c.l.b16 %v212_v59  ;;  %v1031_v11 = vshrl.u32 %v3222_v0, 16 }
  0xca   :  { %v707_v4 = vsel %vm3059_vm9, 0, %v688_v57  ;;  %v138_v6 = vpop.f32.mrf.mxu0  ;;  %vm4128_vm1 = vcmask 518144   ;;  %v3249_v35 = vpack.c.b16 %v3200_v8, %v813_v61  ;;  %v783_v43 = vsel %vm781_vm15, %v3186_v58, %v765_v63 }
  0xcb   :  { %v709_v7 = vsel %vm3064_vm10, %v707_v4, %v701_v62  ;;  %vm165_vm3 = vcmp.ge.f32.partialorder %v138_v6, 0.0  ;;  %v181_v9 = vmul.f32 0.2, %v138_v6  ;;  %v660_v12 = vrot.slane %v659_v2, 4  ;;  %671 = vst.msk [vmem:[#allocation2 + $0x1c] sm:$0xc] %vm418_vm8, %v659_v2 }
  0xcc   :  { %v711_v34 = vsel %vm3068_vm11, %v709_v7, 0  ;;  %v225_v60 = vpack.c.b16 %v223_v5, %v223_v5  ;;  %v745_v13 = vld [vmem:[#allocation2 + $0x18] sm:$0x6]  ;;  %v1033_v61 = vrot.slane %v1031_v11, 7  ;;  %v1034_v55 = vshll.u32 %v3222_v0, 16 }
  0xcd   :  { %v715_v15 = vunpack.c.l.b16 %v711_v34  ;;  %v716_v16 = vunpack.c.h.b16 %v711_v34  ;;  %v197_v17 = vsel %vm165_vm3, %v138_v6, %v181_v9  ;;  %v769_v18 = vunpack.c.l.b16 %v745_v13  ;;  %v1002_v45 = vld [vmem:[#allocation2 + $0x18] sm:$0xe] }
  0xce   :  { %v662_v20 = vsel %vm3117_vm6, %v660_v12, %v661_v3  ;;  %v235_v21 = vshrl.u32 %v225_v60, 16  ;;  %v238_v22 = vshll.u32 %v225_v60, 16  ;;  %v213_v25 = vpack.c.bf16 %v197_v17, %v197_v17 }
  0xcf   :  { %672 = vst.msk [vmem:[#allocation2 + $0x20] sm:$0x7] %vm4128_vm1, %v662_v20  ;;  %v719_v26 = vpack.c.b16 %v715_v15, %v715_v15  ;;  %v720_v27 = vpack.c.b16 %v716_v16, %v716_v16  ;;  %v3241_v30 = vpack.c.b16 %v769_v18, %v769_v18  ;;  %v1046_v56 = vunpack.c.l.b16 %v1002_v45 }
  0xd0   :  { %v237_v36 = vrot.slane %v235_v21, 1  ;;  %v240_v37 = vrot.slane %v238_v22, 2  ;;  %v247_v38 = vrot.slane %v235_v21, 5  ;;  %v248_v39 = vrot.slane %v238_v22, 6 }
  0xd1   :  { %v723_v40 = vrot.slane %v719_v26, 5  ;;  %v290_v41 = vunpack.c.l.b16 %v213_v25  ;;  %v773_v42 = vrot.slane %v3241_v30, 3  ;;  %v725_v47 = vrot.slane %v720_v27, 5 }
  0xd2   :  { %v241_v49 = vor.u32 %v240_v37, %v237_v36  ;;  %v249_v50 = vor.u32 %v248_v39, %v247_v38  ;;  %v141_v48 = vpop.f32.mrf.mxu0  ;;  %v1036_v4 = vor.u32 %v1034_v55, %v1033_v61  ;;  %v3269_v5 = vpack.c.b16 %v1046_v56, %v1046_v56 }
  0xd3   :  { %v724_v51 = vrot.slane %v723_v40, 4  ;;  %735 = vst.msk [vmem:[#allocation2 + $0x20] sm:$0x8] %vm486_vm7, %v723_v40  ;;  %v292_v52 = vpack.c.b16 %v290_v41, %v290_v41  ;;  %vm166_vm1 = vcmp.ge.f32.partialorder %v141_v48, 0.0  ;;  %v182_v53 = vmul.f32 0.2, %v141_v48 }
  0xd4   :  { %v256_v54 = vsel %vm3059_vm9, 0, %v241_v49  ;;  %v788_v58 = vsel %vm786_vm5, %v783_v43, %v773_v42  ;;  %v4103_v15 = vshrl.u32 %v3269_v5, 16  ;;  %v4102_v20 = vshll.u32 %v3269_v5, 16  ;;  %v803_v40 = vld [vmem:[#allocation2 + $0x10] sm:$0xe] }
  0xd5   :  { %v726_v57 = vsel %vm3155_vm0, %v724_v51, %v725_v47  ;;  %v261_v59 = vsel %vm3064_vm10, %v256_v54, %v249_v50  ;;  %v302_v62 = vshrl.u32 %v292_v52, 16  ;;  %v305_v63 = vshll.u32 %v292_v52, 16  ;;  %2657 = vmatmul.msk.bf16.vlgmr.msra.gmra.mxu2 %vm927_vm12, %v788_v58  ;;  %v805_v51 = vld [vmem:[#allocation2 + $0x18] sm:$0x8] }
  0xd6   :  { %736 = vst.msk [vmem:[#allocation2 + $0x24] sm:$0xf] %vm281_vm13, %v726_v57  ;;  %v266_v2 = vsel %vm3068_vm11, %v261_v59, 0  ;;  %v198_v3 = vsel %vm166_vm1, %v141_v48, %v182_v53  ;;  %v1053_v25 = vrot.slane %v4103_v15, 3  ;;  %v3277_v26 = vrot.slane %v1031_v11, 1 }
  0xd7   :  { %v271_v6 = vunpack.c.l.b16 %v266_v2  ;;  %v272_v7 = vunpack.c.h.b16 %v266_v2  ;;  %v304_v9 = vrot.slane %v302_v62, 1  ;;  %v307_v12 = vrot.slane %v305_v63, 2  ;;  %v806_v59 = vld [vmem:[#allocation2 + $0x1c] sm:$0x3] }
  0xd8   :  { %v314_v34 = vrot.slane %v302_v62, 5  ;;  %v315_v60 = vrot.slane %v305_v63, 6  ;;  %v214_v13 = vpack.c.bf16 %v198_v3, %v198_v3  ;;  %v1056_v36 = vrot.slane %v4102_v20, 4 }
  0xd9   :  { %v275_v16 = vpack.c.b16 %v271_v6, %v271_v6  ;;  %v276_v17 = vpack.c.b16 %v272_v7, %v272_v7  ;;  %v308_v18 = vor.u32 %v307_v12, %v304_v9  ;;  %v1067_v37 = vsel %vm403_vm2, 0, %v3204_v31 }
  0xda   :  { %v316_v21 = vor.u32 %v315_v60, %v314_v34  ;;  %v358_v22 = vunpack.c.l.b16 %v214_v13  ;;  %v3279_v27 = vpop.f32.mrf.mxu0  ;;  %v3288_v38 = vrot.slane %v1034_v55, 2  ;;  %v1071_v39 = vsel %vm781_vm15, %v1067_v37, %v1036_v4 }
  0xdb   :  { %285 = vst.msk [vmem:[#allocation2 + $0x28] sm:$0xf] %vm281_vm13, %v275_v16  ;;  %v320_v33 = vsel %vm3059_vm9, 0, %v308_v18  ;;  %v4109_v41 = vshrl.u32 %v3249_v35, 16  ;;  %v1057_v43 = vor.u32 %v1056_v36, %v1053_v25  ;;  %v4108_v45 = vshll.u32 %v3249_v35, 16 }
  0xdc   :  { %286 = vst.msk [vmem:[#allocation2 + $0x2c] sm:$0x1] %vm4079_vm14, %v276_v17  ;;  %v322_v0 = vsel %vm3064_vm10, %v320_v33, %v316_v21  ;;  %v360_v11 = vpack.c.b16 %v358_v22, %v358_v22  ;;  %v837_v54 = vunpack.c.l.b16 %v803_v40  ;;  %v861_v7 = vunpack.c.l.b16 %v805_v51 }
  0xdd   :  { %v324_v42 = vsel %vm3068_vm11, %v322_v0, 0  ;;  %v1075_v61 = vsel %vm786_vm5, %v1071_v39, %v1057_v43  ;;  %v822_v52 = vrot.slane %v4109_v41, 1  ;;  %v825_v53 = vrot.slane %v4108_v45, 2  ;;  %v2981_v45 = vld [vmem:[%s4073_s2 + $0x148] sm:$0xff] }
  0xde   :  { %v329_v47 = vunpack.c.l.b16 %v324_v42  ;;  %v330_v49 = vunpack.c.h.b16 %v324_v42  ;;  %v370_v50 = vshrl.u32 %v360_v11, 16  ;;  %v373_v48 = vshll.u32 %v360_v11, 16  ;;  %2675 = vmatmul.msk.bf16.vlgmr.msra.gmra.mxu3 %vm927_vm12, %v1075_v61  ;;  %v1232_v61 = vld [vmem:[#allocation2 + $0x1c] sm:$0xc] }
  0xdf   :  { %v839_v2 = vpack.c.b16 %v837_v54, %v837_v54  ;;  %v826_v6 = vor.u32 %v825_v53, %v822_v52  ;;  %v3306_v60 = vunpack.c.l.b16 %v806_v59  ;;  %vm4129_vm3 = vcmask 519169  }
  0xe0   :  { %v333_v58 = vpack.c.b16 %v329_v47, %v329_v47  ;;  %v334_v55 = vpack.c.b16 %v330_v49, %v330_v49  ;;  %v372_v56 = vrot.slane %v370_v50, 1  ;;  %v375_v57 = vrot.slane %v373_v48, 2  ;;  %v1230_v47 = vld [vmem:[#allocation2 + $0x14] sm:$0x3] }
  0xe1   :  { %v382_v62 = vrot.slane %v370_v50, 5  ;;  %v383_v63 = vrot.slane %v373_v48, 6  ;;  %v842_v12 = vshrl.u32 %v839_v2, 16  ;;  %v845_v34 = vshll.u32 %v839_v2, 16 }
  0xe2   :  { %v341_v3 = vrot.slane %v333_v58, 7  ;;  %v376_v4 = vor.u32 %v375_v57, %v372_v56  ;;  %v146_v13 = vpop.f32.mrf.mxu0  ;;  %v343_v17 = vrot.slane %v334_v55, 7  ;;  %v865_v33 = vpack.c.b16 %v3306_v60, %v861_v7  ;;  %v3325_v58 = vld [vmem:[#allocation2 + $0x8] sm:$0xc] }
  0xe3   :  { %v384_v9 = vor.u32 %v383_v63, %v382_v62  ;;  %v844_v22 = vrot.slane %v842_v12, 5  ;;  %v847_v25 = vrot.slane %v845_v34, 6  ;;  %v884_v0 = vsel %vm403_vm2, 0, %v826_v6 }
  0xe4   :  { %v342_v16 = vrot.slane %v341_v3, 4  ;;  %353 = vst.msk [vmem:[#allocation2 + $0x2c] sm:$0xe] %vm4129_vm3, %v341_v3  ;;  %v388_v18 = vsel %vm3059_vm9, 0, %v376_v4  ;;  %v1893_v11 = vrot.slane %v842_v12, 7  ;;  %vm4130_vm1 = vcmask 517120  }
  0xe5   :  { %v390_v21 = vsel %vm3064_vm10, %v388_v18, %v384_v9  ;;  %v848_v42 = vor.u32 %v847_v25, %v844_v22  ;;  %v868_v43 = vshrl.u32 %v865_v33, 16  ;;  %v871_v49 = vshll.u32 %v865_v33, 16 }
  0xe6   :  { %v344_v36 = vsel %vm3088_vm4, %v342_v16, %v343_v17  ;;  %v392_v37 = vsel %vm3068_vm11, %v390_v21, 0  ;;  %v3320_v50 = vor.u32 %v1893_v11, %v845_v34  ;;  %vm167_vm3 = vcmp.ge.f32.partialorder %v3279_v27, 0.0 }
  0xe7   :  { %354 = vst.msk [vmem:[#allocation2 + $0x30] sm:$0x3] %vm4130_vm1, %v344_v36  ;;  %v397_v39 = vunpack.c.l.b16 %v392_v37  ;;  %v398_v40 = vunpack.c.h.b16 %v392_v37  ;;  %v183_v48 = vmul.f32 0.2, %v3279_v27  ;;  %v870_v53 = vrot.slane %v868_v43, 5 }
  0xe8   :  { %v888_v54 = vsel %vm781_vm15, %v884_v0, %v848_v42  ;;  %v873_v55 = vrot.slane %v871_v49, 6  ;;  %v1897_v56 = vrot.slane %v868_v43, 7  ;;  %v1236_v59 = vunpack.c.l.b16 %v1230_v47 }
  0xe9   :  { %v401_v51 = vpack.c.b16 %v397_v39, %v397_v39  ;;  %v402_v52 = vpack.c.b16 %v398_v40, %v398_v40  ;;  %v199_v57 = vsel %vm167_vm3, %v3279_v27, %v183_v48  ;;  %v1242_v3 = vunpack.c.l.b16 %v1232_v61 }
  0xea   :  { %v215_v2 = vpack.c.bf16 %v199_v57, %v199_v57  ;;  %v148_v4 = vpop.f32.mrf.mxu0  ;;  %v874_v6 = vor.u32 %v873_v55, %v870_v53  ;;  %v3328_v7 = vor.u32 %v1897_v56, %v871_v49  ;;  %v3330_v9 = vpack.c.b16 %v1236_v59, %v1236_v59 }
  0xeb   :  { %v410_v62 = vrot.slane %v401_v51, 6  ;;  %v412_v63 = vrot.slane %v402_v52, 6  ;;  %v2194_v12 = vunpack.c.l.b16 %v3325_v58  ;;  %v3334_v17 = vpack.c.b16 %v1242_v3, %v1242_v3 }
  0xec   :  { %v427_v16 = vunpack.c.l.b16 %v215_v2  ;;  %vm168_vm1 = vcmp.ge.f32.partialorder %v146_v13, 0.0  ;;  %v892_v27 = vsel %vm786_vm5, %v888_v54, %v874_v6  ;;  %v2200_v21 = vrot.slane %v3330_v9, 6 }
  0xed   :  { %v411_v34 = vrot.slane %v410_v62, 4  ;;  %422 = vst.msk [vmem:[#allocation2 + $0x30] sm:$0xc] %vm418_vm8, %v410_v62  ;;  %v2196_v18 = vpack.c.b16 %v2194_v12, %v2194_v12  ;;  %v184_v22 = vmul.f32 0.2, %v146_v13  ;;  %2639 = vmatmul.msk.bf16.vlgmr.msra.gmra.mxu1 %vm927_vm12, %v892_v27  ;;  %vm169_vm3 = vcmp.ge.f32.partialorder %v148_v4, 0.0 }
  0xee   :  { %v429_v33 = vpack.c.b16 %v427_v16, %v427_v16  ;;  %vm4131_vm14 = vcmask 518144   ;;  %v2202_v37 = vrot.slane %v3334_v17, 6  ;;  %v185_v11 = vmul.f32 0.2, %v148_v4  ;;  %v1226_v16 = vld [vmem:[#allocation2] sm:$0x3] }
  0xef   :  { %v413_v25 = vsel %vm3117_vm6, %v411_v34, %v412_v63  ;;  %v2198_v36 = vrot.slane %v2196_v18, 2  ;;  %v200_v0 = vsel %vm168_vm1, %v146_v13, %v184_v22 }
  0xf0   :  { %423 = vst.msk [vmem:[#allocation2 + $0x34] sm:$0x7] %vm4131_vm14, %v413_v25  ;;  %v439_v39 = vshrl.u32 %v429_v33, 16  ;;  %v442_v40 = vshll.u32 %v429_v33, 16  ;;  %v216_v42 = vpack.c.bf16 %v200_v0, %v200_v0  ;;  %v201_v47 = vsel %vm169_vm3, %v148_v4, %v185_v11 }
  0xf1   :  { %v2206_v43 = vsel %vm403_vm2, %v2198_v36, %v2200_v21  ;;  %v217_v55 = vpack.c.bf16 %v201_v47, %v201_v47  ;;  %v3355_v21 = vsel %vm403_vm2, %v1226_v16, %v3325_v58  ;;  %v2955_v58 = vld [vmem:[%s4073_s2 + $0x98] sm:$0xff]  ;;  %vm4132_vm3 = vcmask 516096  }
  0xf2   :  { %v441_v49 = vrot.slane %v439_v39, 1  ;;  %v444_v48 = vrot.slane %v442_v40, 2  ;;  %v451_v61 = vrot.slane %v439_v39, 5  ;;  %v452_v51 = vrot.slane %v442_v40, 6  ;;  %v151_v52 = vpop.f32.mrf.mxu0  ;;  %1300 = vmatpush.bf16.msrb.mxu2 %v2955_v58 }
  0xf3   :  { %v2211_v53 = vsel %vm781_vm15, %v2206_v43, %v2202_v37  ;;  %v494_v54 = vunpack.c.l.b16 %v216_v42  ;;  %vm170_vm14 = vcmp.ge.f32.partialorder %v151_v52, 0.0  ;;  %v186_v59 = vmul.f32 0.2, %v151_v52 }
  0xf4   :  { %v445_v56 = vor.u32 %v444_v48, %v441_v49  ;;  %v453_v57 = vor.u32 %v452_v51, %v451_v61  ;;  %v2214_v13 = vsel %vm786_vm5, %v2211_v53, 0  ;;  %v550_v63 = vunpack.c.l.b16 %v217_v55  ;;  %v2959_v53 = vld [vmem:[%s4073_s2 + $0xb8] sm:$0xff] }
  0xf5   :  { %2871 = vmatmul.msk.bf16.vlgmr.msrb.gmra.mxu0 %vm927_vm12, %v2214_v13  ;;  %v496_v62 = vpack.c.b16 %v494_v54, %v494_v54  ;;  %v202_v3 = vsel %vm170_vm14, %v151_v52, %v186_v59  ;;  %v2951_v54 = vld [vmem:[%s4073_s2 + $0x78] sm:$0xff]  ;;  %1481 = vmatpush.bf16.msrb.mxu3 %v2959_v53  ;;  %vm4133_vm14 = vcmask 519169  }
  0xf6   :  { %v457_v2 = vsel %vm3059_vm9, 0, %v445_v56  ;;  %v552_v34 = vpack.c.b16 %v550_v63, %v550_v63  ;;  %v218_v18 = vpack.c.bf16 %v202_v3, %v202_v3  ;;  %v2958_v3 = vld [vmem:[%s4073_s2 + $0xb0] sm:$0xff]  ;;  %1207 = vmatpush.bf16.msrb.mxu1 %v2951_v54 }
  0xf7   :  { %v459_v4 = vsel %vm3064_vm10, %v457_v2, %v453_v57  ;;  %v506_v6 = vshrl.u32 %v496_v62, 16  ;;  %v509_v12 = vshll.u32 %v496_v62, 16  ;;  %v2954_v2 = vld [vmem:[%s4073_s2 + $0x90] sm:$0xff] }
  0xf8   :  { %v461_v27 = vsel %vm3068_vm11, %v459_v4, 0  ;;  %v562_v11 = vshrl.u32 %v552_v34, 16  ;;  %v565_v39 = vshll.u32 %v552_v34, 16  ;;  %v614_v47 = vunpack.c.l.b16 %v218_v18  ;;  %v2950_v4 = vld [vmem:[%s4073_s2 + $0x70] sm:$0xff]  ;;  %1301 = vmatpush.bf16.msrb.mxu2 %v2954_v2 }
  0xf9   :  { %v466_v22 = vunpack.c.l.b16 %v461_v27  ;;  %v467_v25 = vunpack.c.h.b16 %v461_v27  ;;  %v508_v33 = vrot.slane %v506_v6, 1  ;;  %v511_v36 = vrot.slane %v509_v12, 2  ;;  %1482 = vmatpush.bf16.msrb.mxu3 %v2958_v3  ;;  %v3407_v3 = vld [vmem:[#allocation2 + $0x2c] sm:$0x8] }
  0xfa   :  { %v518_v37 = vrot.slane %v506_v6, 5  ;;  %v519_v0 = vrot.slane %v509_v12, 6  ;;  %v153_v49 = vpop.f32.mrf.mxu0  ;;  %v564_v61 = vrot.slane %v562_v11, 1  ;;  %v567_v51 = vrot.slane %v565_v39, 2  ;;  %1208 = vmatpush.bf16.msrb.mxu1 %v2950_v4 }
  0xfb   :  { %v470_v40 = vpack.c.b16 %v466_v22, %v466_v22  ;;  %v471_v42 = vpack.c.b16 %v467_v25, %v467_v25  ;;  %v512_v43 = vor.u32 %v511_v36, %v508_v33  ;;  %v574_v52 = vrot.slane %v562_v11, 5  ;;  %v3384_v33 = vld [vmem:[#allocation2] sm:$0xc] }
  0xfc   :  { %v520_v48 = vor.u32 %v519_v0, %v518_v37  ;;  %v575_v13 = vrot.slane %v565_v39, 6  ;;  %v568_v62 = vor.u32 %v567_v51, %v564_v61  ;;  %v616_v63 = vpack.c.b16 %v614_v47, %v614_v47  ;;  %v740_v39 = vld [vmem:[#allocation2 + $0x2c] sm:$0x6] }
  0xfd   :  { %v478_v55 = vrot.slane %v470_v40, 5  ;;  %v480_v56 = vrot.slane %v471_v42, 5  ;;  %v524_v57 = vsel %vm3059_vm9, 0, %v512_v43  ;;  %vm171_vm1 = vcmp.ge.f32.partialorder %v153_v49, 0.0  ;;  %v999_v40 = vld [vmem:[#allocation2 + $0x2c] sm:$0xe] }
  0xfe   :  { %v526_v59 = vsel %vm3064_vm10, %v524_v57, %v520_v48  ;;  %v576_v34 = vor.u32 %v575_v13, %v574_v52  ;;  %v187_v16 = vmul.f32 0.2, %v153_v49  ;;  %v580_v22 = vsel %vm3059_vm9, 0, %v568_v62  ;;  %v2953_v61 = vld [vmem:[%s4073_s2 + $0x88] sm:$0xff] }
  0xff   :  { %v479_v6 = vrot.slane %v478_v55, 4  ;;  %489 = vst.msk [vmem:[#allocation2 + $0x34] sm:$0x8] %vm486_vm7, %v478_v55  ;;  %v528_v12 = vsel %vm3068_vm11, %v526_v59, 0  ;;  %v626_v25 = vshrl.u32 %v616_v63, 16  ;;  %v629_v0 = vshll.u32 %v616_v63, 16  ;;  %1302 = vmatpush.bf16.msrb.mxu2 %v2953_v61 }
 0x100   :  { %v533_v27 = vunpack.c.l.b16 %v528_v12  ;;  %v534_v18 = vunpack.c.h.b16 %v528_v12  ;;  %v582_v37 = vsel %vm3064_vm10, %v580_v22, %v576_v34  ;;  %v203_v11 = vsel %vm171_vm1, %v153_v49, %v187_v16  ;;  %v2957_v49 = vld [vmem:[%s4073_s2 + $0xa8] sm:$0xff]  ;;  %v3404_v59 = vld [vmem:[#allocation2 + $0x4] sm:$0x1] }
 0x101   :  { %v481_v36 = vsel %vm3155_vm0, %v479_v6, %v480_v56  ;;  %v584_v47 = vsel %vm3068_vm11, %v582_v37, 0  ;;  %v628_v48 = vrot.slane %v626_v25, 1  ;;  %v631_v58 = vrot.slane %v629_v0, 2  ;;  %v2949_v13 = vld [vmem:[%s4073_s2 + $0x68] sm:$0xff]  ;;  %1483 = vmatpush.bf16.msrb.mxu3 %v2957_v49  ;;  %v2956_v22 = vld [vmem:[%s4073_s2 + $0xa0] sm:$0xff] }
 0x102   :  { %490 = vst.msk [vmem:[#allocation2 + $0x38] sm:$0xf] %vm281_vm13, %v481_v36  ;;  %v537_v42 = vpack.c.b16 %v533_v27, %v533_v27  ;;  %v538_v43 = vpack.c.b16 %v534_v18, %v534_v18  ;;  %v589_v51 = vunpack.c.l.b16 %v584_v47  ;;  %v590_v52 = vunpack.c.h.b16 %v584_v47  ;;  %v2952_v18 = vld [vmem:[%s4073_s2 + $0x80] sm:$0xff]  ;;  %1209 = vmatpush.bf16.msrb.mxu1 %v2949_v13  ;;  %v802_v47 = vld [vmem:[#allocation2 + $0x30] sm:$0x3] }
 0x103   :  { %v638_v53 = vrot.slane %v626_v25, 5  ;;  %v639_v54 = vrot.slane %v629_v0, 6  ;;  %v219_v55 = vpack.c.bf16 %v203_v11, %v203_v11  ;;  %v750_v56 = vunpack.c.l.b16 %v740_v39  ;;  %v2948_v0 = vld [vmem:[%s4073_s2 + $0x60] sm:$0xff]  ;;  %1303 = vmatpush.bf16.msrb.mxu2 %v2952_v18 }
 0x104   :  { %545 = vst.msk [vmem:[#allocation2 + $0x3c] sm:$0xf] %vm281_vm13, %v537_v42  ;;  %v1007_v57 = vunpack.c.l.b16 %v999_v40  ;;  %v593_v62 = vpack.c.b16 %v589_v51, %v589_v51  ;;  %v594_v63 = vpack.c.b16 %v590_v52, %v590_v52  ;;  %v632_v2 = vor.u32 %v631_v58, %v628_v48  ;;  %v2971_v48 = vld [vmem:[%s4073_s2 + $0xf8] sm:$0xff] }
 0x105   :  { %546 = vst.msk [vmem:[#allocation2 + $0x40] sm:$0x1] %vm4132_vm3, %v538_v43  ;;  %v1335_v4 = vunpack.c.l.b16 %v3384_v33  ;;  %v640_v6 = vor.u32 %v639_v54, %v638_v53  ;;  %v678_v12 = vunpack.c.l.b16 %v219_v55  ;;  %v3410_v16 = vpack.c.b16 %v750_v56, %v750_v56  ;;  %1484 = vmatpush.bf16.msrb.mxu3 %v2956_v22 }
 0x106   :  { %v743_v34 = vld [vmem:[#allocation2 + $0x34] sm:$0x8]  ;;  %v3412_v27 = vpack.c.b16 %v1007_v57, %v1007_v57  ;;  %v599_v25 = vrot.slane %v593_v62, 7  ;;  %v601_v36 = vrot.slane %v594_v63, 7  ;;  %v644_v37 = vsel %vm3059_vm9, 0, %v632_v2  ;;  %1210 = vmatpush.bf16.msrb.mxu1 %v2948_v0 }
 0x107   :  { %v4110_v11 = vunpack.c.l.b16 %v3404_v59  ;;  %v646_v39 = vsel %vm3064_vm10, %v644_v37, %v640_v6  ;;  %v680_v40 = vpack.c.b16 %v678_v12, %v678_v12  ;;  %v754_v42 = vrot.slane %v3410_v16, 7  ;;  %1771 = vmatpush.bf16.msra.mxu2 %v2971_v48 }
 0x108   :  { %v4089_v43 = vshrl.u32 %v3412_v27, 16  ;;  %v600_v61 = vrot.slane %v599_v25, 4  ;;  %609 = vst.msk [vmem:[#allocation2 + $0x40] sm:$0xe] %vm4133_vm14, %v599_v25  ;;  %v648_v49 = vsel %vm3068_vm11, %v646_v39, 0  ;;  %v761_v52 = vunpack.c.l.b16 %v743_v34 }
 0x109   :  { %v744_v51 = vld [vmem:[#allocation2 + $0x38] sm:$0x1]  ;;  %v815_v58 = vunpack.c.l.b16 %v3407_v3  ;;  %v653_v53 = vunpack.c.l.b16 %v648_v49  ;;  %v654_v54 = vunpack.c.h.b16 %v648_v49  ;;  %v690_v55 = vshrl.u32 %v680_v40, 16 }
 0x10a   :  { %v693_v56 = vshll.u32 %v680_v40, 16  ;;  %v602_v57 = vsel %vm3088_vm4, %v600_v61, %v601_v36  ;;  %v762_v13 = vunpack.c.l.b16 %v744_v51  ;;  %v1001_v62 = vld [vmem:[#allocation2 + $0x38] sm:$0x3]  ;;  %v1020_v63 = vrot.slane %v4089_v43, 7 }
 0x10b   :  { %v3441_v2 = vunpack.c.l.b16 %v802_v47  ;;  %vm4134_vm1 = vcmask 517120   ;;  %v657_v3 = vpack.c.b16 %v653_v53, %v653_v53  ;;  %v658_v6 = vpack.c.b16 %v654_v54, %v654_v54  ;;  %v2975_v49 = vld [vmem:[%s4073_s2 + $0x118] sm:$0xff] }
 0x10c   :  { %610 = vst.msk [vmem:[#allocation2 + $0x44] sm:$0x3] %vm4134_vm1, %v602_v57  ;;  %v692_v12 = vrot.slane %v690_v55, 1  ;;  %v695_v34 = vrot.slane %v693_v56, 2  ;;  %v702_v18 = vrot.slane %v690_v55, 5  ;;  %v703_v22 = vrot.slane %v693_v56, 6  ;;  %1866 = vmatpush.bf16.msra.mxu3 %v2975_v49 }
 0x10d   :  { %v3444_v25 = vpack.c.b16 %v762_v13, %v761_v52  ;;  %v4091_v10 = vshll.u32 %v3412_v27, 16  ;;  %v663_v36 = vrot.slane %v657_v3, 6  ;;  %v665_v37 = vrot.slane %v658_v6, 6 }
 0x10e   :  { %v696_v39 = vor.u32 %v695_v34, %v692_v12  ;;  %v1027_v40 = vunpack.c.l.b16 %v1001_v62  ;;  %v704_v47 = vor.u32 %v703_v22, %v702_v18  ;;  %v780_v48 = vsel %vm403_vm2, 0, %v754_v42  ;;  %v2967_v22 = vld [vmem:[%s4073_s2 + $0xd8] sm:$0xff] }
 0x10f   :  { %v766_v0 = vrot.slane %v3444_v25, 7  ;;  %v1023_v61 = vor.u32 %v4091_v10, %v1020_v63  ;;  %v664_v51 = vrot.slane %v663_v36, 4  ;;  %673 = vst.msk [vmem:[#allocation2 + $0x44] sm:$0xc] %vm418_vm8, %v663_v36  ;;  %v746_v54 = vld [vmem:[#allocation2 + $0x40] sm:$0x6]  ;;  %v3460_v56 = vpack.c.b16 %v3441_v2, %v815_v58  ;;  %1658 = vmatpush.bf16.msra.mxu1 %v2967_v22 }
 0x110   :  { %v708_v53 = vsel %vm3059_vm9, 0, %v696_v39  ;;  %v3457_v55 = vpack.c.b16 %v1027_v40, %v761_v52  ;;  %v770_v57 = vunpack.c.l.b16 %v746_v54  ;;  %v1003_v62 = vld [vmem:[#allocation2 + $0x40] sm:$0xe]  ;;  %v3469_v63 = vpack.c.b16 %v4110_v11, %v1335_v4  ;;  %v804_v4 = vld [vmem:[#allocation2 + $0x38] sm:$0xe]  ;;  %v2970_v36 = vld [vmem:[%s4073_s2 + $0xf0] sm:$0xff] }
 0x111   :  { %v710_v42 = vsel %vm3064_vm10, %v708_v53, %v704_v47  ;;  %v785_v13 = vsel %vm781_vm15, %v780_v48, %v766_v0  ;;  %v666_v24 = vsel %vm3117_vm6, %v664_v51, %v665_v37  ;;  %v1069_v58 = vsel %vm403_vm2, 0, %v1023_v61  ;;  %v807_v0 = vld [vmem:[#allocation2 + $0x40] sm:$0x8]  ;;  %v3494_v48 = vld [vmem:[#allocation2 + $0x30] sm:$0xc]  ;;  %1772 = vmatpush.bf16.msra.mxu2 %v2970_v36 }
 0x112   :  { %v712_v52 = vsel %vm3068_vm11, %v710_v42, 0  ;;  %v4088_v28 = vshrl.u32 %v3457_v55, 16  ;;  %vm4135_vm9 = vcmask 518144   ;;  %v3478_v33 = vpack.c.b16 %v770_v57, %v770_v57  ;;  %v2974_v61 = vld [vmem:[%s4073_s2 + $0x110] sm:$0xff]  ;;  %v1327_v10 = vld [vmem:[#allocation2 + $0x3c] sm:$0xc] }
 0x113   :  { %674 = vst.msk [vmem:[#allocation2 + $0x48] sm:$0x7] %vm4135_vm9, %v666_v24  ;;  %v717_v3 = vunpack.c.l.b16 %v712_v52  ;;  %v718_v6 = vunpack.c.h.b16 %v712_v52  ;;  %v1047_v12 = vunpack.c.l.b16 %v1003_v62  ;;  %v4090_v46 = vshll.u32 %v3457_v55, 16  ;;  %v808_v51 = vld [vmem:[#allocation2 + $0x44] sm:$0x3]  ;;  %v2966_v57 = vld [vmem:[%s4073_s2 + $0xd0] sm:$0xff]  ;;  %1867 = vmatpush.bf16.msra.mxu3 %v2974_v61 }
 0x114   :  { %v1040_v34 = vrot.slane %v4088_v28, 7  ;;  %v4081_v29 = vshrl.u32 %v3460_v56, 16  ;;  %v4080_v18 = vshll.u32 %v3460_v56, 16  ;;  %v774_v40 = vrot.slane %v3478_v33, 3  ;;  %1659 = vmatpush.bf16.msra.mxu1 %v2966_v57 }
 0x115   :  { %v721_v37 = vpack.c.b16 %v717_v3, %v717_v3  ;;  %v722_v39 = vpack.c.b16 %v718_v6, %v718_v6  ;;  %v3492_v47 = vpack.c.b16 %v1047_v12, %v1047_v12  ;;  %v838_v42 = vunpack.c.l.b16 %v804_v4 }
 0x116   :  { %v1043_v49 = vor.u32 %v4090_v46, %v1040_v34  ;;  %v830_v53 = vrot.slane %v4081_v29, 1  ;;  %v833_v54 = vrot.slane %v4080_v18, 2  ;;  %v790_v52 = vsel %vm786_vm5, %v785_v13, %v774_v40  ;;  %v1231_v34 = vld [vmem:[#allocation2 + $0x3c] sm:$0x3]  ;;  %v1233_v22 = vld [vmem:[#allocation2 + $0x44] sm:$0xc] }
 0x117   :  { %v727_v62 = vrot.slane %v721_v37, 5  ;;  %v729_v24 = vrot.slane %v722_v39, 5  ;;  %v4087_v3 = vshrl.u32 %v3492_v47, 16  ;;  %2658 = vmatmul.msk.bf16.gmra.mxu2 %vm927_vm12, %v790_v52  ;;  %v4082_v6 = vshll.u32 %v3492_v47, 16  ;;  %v2969_v37 = vld [vmem:[%s4073_s2 + $0xe8] sm:$0xff] }
 0x118   :  { %v1073_v12 = vsel %vm781_vm15, %v1069_v58, %v1043_v49  ;;  %v3513_v4 = vpack.c.b16 %v838_v42, %v838_v42  ;;  %v2195_v36 = vunpack.c.l.b16 %v3494_v48  ;;  %v863_v40 = vunpack.c.l.b16 %v807_v0  ;;  %1773 = vmatpush.bf16.msra.mxu2 %v2969_v37  ;;  %v3614_v46 = vld [vmem:[#allocation2 + $0x2c] sm:$0x1] }
 0x119   :  { %v728_v13 = vrot.slane %v727_v62, 4  ;;  %737 = vst.msk [vmem:[#allocation2 + $0x48] sm:$0x8] %vm486_vm7, %v727_v62  ;;  %v1061_v39 = vrot.slane %v4087_v3, 3  ;;  %v3522_v61 = vunpack.c.l.b16 %v808_v51  ;;  %v1064_v58 = vrot.slane %v4082_v6, 4 }
 0x11a   :  { %v834_v49 = vor.u32 %v833_v54, %v830_v53  ;;  %v4086_v42 = vshrl.u32 %v3513_v4, 16  ;;  %v4083_v52 = vshll.u32 %v3513_v4, 16  ;;  %v1237_v29 = vunpack.c.l.b16 %v1231_v34  ;;  %v1323_v34 = vld [vmem:[#allocation2 + $0xc] sm:$0x7] }
 0x11b   :  { %v730_v18 = vsel %vm3155_vm0, %v728_v13, %v729_v24  ;;  %v3531_v62 = vpack.c.b16 %v3522_v61, %v863_v40  ;;  %v1243_v0 = vunpack.c.l.b16 %v1233_v22  ;;  %v1065_v51 = vor.u32 %v1064_v58, %v1061_v39  ;;  %v1325_v22 = vld [vmem:[#allocation2 + $0x14] sm:$0xc]  ;;  %v3548_v58 = vld [vmem:[#allocation2 + $0x18] sm:$0x1] }
 0x11c   :  { %738 = vst.msk [vmem:[#allocation2 + $0x4c] sm:$0xf] %vm281_vm13, %v730_v18  ;;  %v852_v53 = vrot.slane %v4086_v42, 5  ;;  %v855_v54 = vrot.slane %v4083_v52, 6  ;;  %v2197_v6 = vpack.c.b16 %v2195_v36, %v2195_v36  ;;  %v3540_v24 = vpack.c.b16 %v1237_v29, %v1237_v29  ;;  %v1329_v36 = vld [vmem:[#allocation2 + $0x20] sm:$0x7] }
 0x11d   :  { %v4084_v57 = vshrl.u32 %v3531_v62, 16  ;;  %v4085_v19 = vshll.u32 %v3531_v62, 16  ;;  %v3542_v37 = vpack.c.b16 %v1243_v0, %v1243_v0  ;;  %v1077_v18 = vsel %vm786_vm5, %v1073_v12, %v1065_v51 }
 0x11e   :  { %v856_v13 = vor.u32 %v855_v54, %v852_v53  ;;  %v2199_v39 = vrot.slane %v2197_v6, 2  ;;  %v1253_v40 = vsel %vm781_vm15, %v3355_v21, %v3330_v9  ;;  %2676 = vmatmul.msk.bf16.gmra.mxu3 %vm927_vm12, %v1077_v18  ;;  %v2201_v52 = vrot.slane %v3540_v24, 6  ;;  %v2973_v6 = vld [vmem:[%s4073_s2 + $0x108] sm:$0xff] }
 0x11f   :  { %v878_v29 = vrot.slane %v4084_v57, 5  ;;  %v881_v0 = vrot.slane %v4085_v19, 6  ;;  %v2203_v12 = vrot.slane %v3542_v37, 6  ;;  %v886_v9 = vsel %vm403_vm2, 0, %v834_v49  ;;  %1868 = vmatpush.bf16.msra.mxu3 %v2973_v6 }
 0x120   :  { %v1342_v21 = vshrl.u32 %v3469_v63, 16  ;;  %v1359_v51 = vunpack.c.l.b16 %v1323_v34  ;;  %v1383_v53 = vunpack.c.l.b16 %v1325_v22  ;;  %v2209_v18 = vsel %vm403_vm2, %v2199_v39, %v2201_v52  ;;  %v3577_v39 = vld [vmem:[#allocation2 + $0x10] sm:$0xc] }
 0x121   :  { %v882_v54 = vor.u32 %v881_v0, %v878_v29  ;;  %v1384_v57 = vunpack.c.l.b16 %v3548_v58  ;;  %v1407_v19 = vunpack.c.l.b16 %v1329_v36  ;;  %v890_v42 = vsel %vm781_vm15, %v886_v9, %v856_v13  ;;  %v2965_v36 = vld [vmem:[%s4073_s2 + $0xc8] sm:$0xff]  ;;  %v2972_v29 = vld [vmem:[%s4073_s2 + $0x100] sm:$0xff] }
 0x122   :  { %v2213_v3 = vsel %vm781_vm15, %v2209_v18, %v2203_v12  ;;  %v1345_v28 = vshll.u32 %v3469_v63, 16  ;;  %v3567_v43 = vpack.c.b16 %v1359_v51, %v1359_v51  ;;  %v1257_v63 = vsel %vm786_vm5, %v1253_v40, %v3334_v17  ;;  %1660 = vmatpush.bf16.msra.mxu1 %v2965_v36 }
 0x123   :  { %v894_v49 = vsel %vm786_vm5, %v890_v42, %v882_v54  ;;  %v2215_v34 = vsel %vm786_vm5, %v2213_v3, 0  ;;  %v3573_v22 = vpack.c.b16 %v1384_v57, %v1383_v53  ;;  %v3575_v52 = vpack.c.b16 %v1407_v19, %v1407_v19  ;;  %v2968_v19 = vld [vmem:[%s4073_s2 + $0xe0] sm:$0xff]  ;;  %v1321_v53 = vld [vmem:[#allocation2 + $0x28] sm:$0xc]  ;;  %1869 = vmatpush.bf16.msra.mxu3 %v2972_v29 }
 0x124   :  { %2640 = vmatmul.msk.bf16.gmra.mxu1 %vm927_vm12, %v894_v49  ;;  %2872 = vmatmul.msk.bf16.gmra.mxu0 %vm927_vm12, %v2215_v34  ;;  %v1344_v13 = vrot.slane %v1342_v21, 2  ;;  %v4093_v42 = vshrl.u32 %v3567_v43, 16  ;;  %v4096_v3 = vshll.u32 %v3567_v43, 16  ;;  %v1347_v6 = vrot.slane %v1345_v28, 3  ;;  %v2964_v54 = vld [vmem:[%s4073_s2 + $0xc0] sm:$0xff] }
 0x125   :  { %v4092_v0 = vshrl.u32 %v3573_v22, 16  ;;  %v4094_v17 = vshll.u32 %v3573_v22, 16  ;;  %v4095_v40 = vshrl.u32 %v3575_v52, 16  ;;  %v4097_v12 = vshll.u32 %v3575_v52, 16  ;;  %1774 = vmatpush.bf16.msra.mxu2 %v2968_v19  ;;  %v1324_v19 = vld [vmem:[#allocation2 + $0x34] sm:$0x7] }
 0x126   :  { %v1366_v9 = vrot.slane %v4093_v42, 6  ;;  %v1369_v21 = vrot.slane %v4096_v3, 7  ;;  %v1145_v51 = vunpack.c.l.b16 %v3577_v39  ;;  %v1337_v3 = vunpack.c.l.b16 %v1321_v53  ;;  %v1330_v29 = vld [vmem:[#allocation2 + $0x48] sm:$0x7]  ;;  %1661 = vmatpush.bf16.msra.mxu1 %v2964_v54 }
 0x127   :  { %v1392_v18 = vrot.slane %v4092_v0, 6  ;;  %v1395_v28 = vrot.slane %v4094_v17, 7  ;;  %v1414_v49 = vrot.slane %v4095_v40, 2  ;;  %v1417_v34 = vrot.slane %v4097_v12, 3  ;;  %2711 = vmatmul.msk.bf16.vlgmr.msrb.gmra.mxu2 %vm927_vm12, %v1257_v63  ;;  %v2983_v0 = vld [vmem:[%s4073_s2 + $0x158] sm:$0xff] }
 0x128   :  { %v1370_v36 = vor.u32 %v1369_v21, %v1366_v9  ;;  %v1139_v17 = vpack.c.b16 %v3200_v8, %v3200_v8  ;;  %v3622_v40 = vld [vmem:[#allocation2 + $0x40] sm:$0x1]  ;;  %v1348_v12 = vor.u32 %v1347_v6, %v1344_v13  ;;  %v1147_v31 = vpack.c.b16 %v1145_v51, %v1145_v51 }
 0x129   :  { %v1396_v42 = vor.u32 %v1395_v28, %v1392_v18  ;;  %v1418_v14 = vor.u32 %v1417_v34, %v1414_v49  ;;  %v4101_v63 = vunpack.c.l.b16 %v3614_v46  ;;  %2092 = vmatpush.bf16.msrb.mxu2 %v2983_v0  ;;  %v3627_v9 = vpack.c.b16 %v3306_v60, %v3306_v60 }
 0x12a   :  { %v1360_v21 = vunpack.c.l.b16 %v1324_v19  ;;  %v1385_v18 = vunpack.c.l.b16 %v1327_v10  ;;  %v1429_v28 = vsel %vm403_vm2, %v1348_v12, %v1370_v36  ;;  %v4098_v13 = vunpack.c.l.b16 %v3622_v40 }
 0x12b   :  { %v1340_v8 = vpack.c.b16 %v4101_v63, %v1337_v3  ;;  %v1434_v6 = vsel %vm781_vm15, %v1429_v28, %v1396_v42  ;;  %v1141_v51 = vrot.slane %v1139_v17, 6  ;;  %v1408_v54 = vunpack.c.l.b16 %v1330_v29  ;;  %v2987_v42 = vld [vmem:[%s4073_s2 + $0x178] sm:$0xff] }
 0x12c   :  { %v3634_v53 = vpack.c.b16 %v1360_v21, %v1360_v21  ;;  %v1438_v0 = vsel %vm786_vm5, %v1434_v6, %v1418_v14  ;;  %v1149_v49 = vrot.slane %v1147_v31, 6  ;;  %v3639_v60 = vpack.c.b16 %v4098_v13, %v1385_v18  ;;  %v3659_v13 = vld [vmem:[#allocation2 + $0x38] sm:$0xc] }
 0x12d   :  { %v1153_v10 = vrot.slane %v3627_v9, 2  ;;  %v1350_v3 = vshrl.u32 %v1340_v8, 16  ;;  %v3643_v12 = vpack.c.b16 %v1408_v54, %v1408_v54  ;;  %v1353_v17 = vshll.u32 %v1340_v8, 16  ;;  %v1679_v8 = vld [vmem:[#allocation2 + $0xc] sm:$0x6] }
 0x12e   :  { %2729 = vmatmul.msk.bf16.vlgmr.msrb.gmra.mxu3 %vm927_vm12, %v1438_v0  ;;  %v4099_v34 = vshrl.u32 %v3634_v53, 16  ;;  %v4100_v14 = vshll.u32 %v3634_v53, 16  ;;  %v1156_v31 = vsel %vm403_vm2, 0, %v1141_v51  ;;  %v4104_v36 = vshrl.u32 %v3639_v60, 16  ;;  %v1227_v0 = vld [vmem:[#allocation2 + $0x28] sm:$0x3] }
 0x12f   :  { %v4107_v19 = vshll.u32 %v3639_v60, 16  ;;  %2173 = vmatpush.bf16.msrb.mxu3 %v2987_v42  ;;  %v1796_v29 = vrot.slane %v3215_v44, 1  ;;  %v1160_v21 = vsel %vm781_vm15, %v1156_v31, %v1149_v49  ;;  %v4105_v18 = vshrl.u32 %v3643_v12, 16  ;;  %v2979_v31 = vld [vmem:[%s4073_s2 + $0x138] sm:$0xff] }
 0x130   :  { %v4106_v28 = vshll.u32 %v3643_v12, 16  ;;  %v1798_v6 = vrot.slane %v3241_v30, 5  ;;  %v1164_v54 = vsel %vm786_vm5, %v1160_v21, %v1153_v10  ;;  %v1352_v51 = vrot.slane %v1350_v3, 2  ;;  %v2982_v30 = vld [vmem:[%s4073_s2 + $0x150] sm:$0xff] }
 0x131   :  { %v1355_v42 = vrot.slane %v1353_v17, 3  ;;  %v1374_v44 = vrot.slane %v4099_v34, 6  ;;  %v1377_v49 = vrot.slane %v4100_v14, 7  ;;  %v2986_v10 = vld [vmem:[%s4073_s2 + $0x170] sm:$0xff]  ;;  %v1251_v3 = vsel %vm403_vm2, %v1227_v0, %v3494_v48  ;;  %v1683_v48 = vld [vmem:[#allocation2 + $0x20] sm:$0x6]  ;;  %2093 = vmatpush.bf16.msrb.mxu2 %v2982_v30 }
 0x132   :  { %v1400_v17 = vrot.slane %v4104_v36, 6  ;;  %v1403_v21 = vrot.slane %v4107_v19, 7  ;;  %v1681_v34 = vld [vmem:[#allocation2 + $0x14] sm:$0x8]  ;;  %v1255_v14 = vsel %vm781_vm15, %v1251_v3, %v3540_v24  ;;  %v1422_v63 = vrot.slane %v4105_v18, 2 }
 0x133   :  { %v1425_v20 = vrot.slane %v4106_v28, 3  ;;  %v1146_v15 = vunpack.c.l.b16 %v3659_v13  ;;  %v2978_v0 = vld [vmem:[%s4073_s2 + $0x130] sm:$0xff]  ;;  %v1794_v36 = vrot.slane %v3164_v23, 1  ;;  %v1259_v24 = vsel %vm786_vm5, %v1255_v14, %v3542_v37  ;;  %2174 = vmatpush.bf16.msrb.mxu3 %v2986_v10  ;;  %v1500_v30 = vld [vmem:[#allocation2] sm:$0x7] }
 0x134   :  { %2693 = vmatmul.msk.bf16.vlgmr.msrb.gmra.mxu1 %vm927_vm12, %v1164_v54  ;;  %v1677_v54 = vld [vmem:[#allocation2] sm:$0x8]  ;;  %v1695_v3 = vunpack.c.l.b16 %v1679_v8  ;;  %v1356_v18 = vor.u32 %v1355_v42, %v1352_v51  ;;  %v1378_v28 = vor.u32 %v1377_v49, %v1374_v44  ;;  %v1140_v19 = vpack.c.b16 %v3441_v2, %v3441_v2  ;;  %v2960_v14 = vld [vmem:[#allocation2 + $0x8] sm:$0x10]  ;;  %v2733_v42 = vld [vmem:[#allocation2 + $0x8] sm:$0xc] }
 0x135   :  { %1977 = vmatpush.bf16.msrb.mxu1 %v2979_v31  ;;  %v1703_v31 = vunpack.c.l.b16 %v1681_v34  ;;  %v1404_v41 = vor.u32 %v1403_v21, %v1400_v17  ;;  %v1687_v23 = vunpack.c.l.b16 %v1677_v54  ;;  %v1711_v11 = vunpack.c.l.b16 %v1683_v48  ;;  %2094 = vmatpush.bf16.msrb.mxu2 %v2981_v45  ;;  %v1506_v44 = vld [vmem:[#allocation2 + $0x14] sm:$0x7]  ;;  %v2962_v48 = vld [vmem:[#allocation2 + $0x1c] sm:$0x10] }
 0x136   :  { %v1814_v37 = vsel %vm403_vm2, %v1794_v36, %v1796_v29  ;;  %v1426_v8 = vor.u32 %v1425_v20, %v1422_v63  ;;  %v1148_v10 = vpack.c.b16 %v1146_v15, %v1146_v15  ;;  %v3706_v2 = vpack.c.b16 %v3522_v61, %v3522_v61  ;;  %v3715_v20 = vld [vmem:[#allocation2 + $0x20] sm:$0x8] }
 0x137   :  { %2712 = vmatmul.msk.bf16.gmra.mxu2 %vm927_vm12, %v1259_v24  ;;  %v1791_v24 = vld [vmem:[#allocation2 + $0x24] sm:$0x1]  ;;  %v3702_v51 = vsel %vm781_vm15, %v1814_v37, %v1798_v6  ;;  %v3708_v34 = vpack.c.b16 %v1695_v3, %v1695_v3  ;;  %v1514_v49 = vunpack.c.l.b16 %v1500_v30  ;;  %v1432_v36 = vsel %vm403_vm2, %v1356_v18, %v1378_v28 }
 0x138   :  { %v1142_v29 = vrot.slane %v1140_v19, 6  ;;  %v3713_v15 = vpack.c.b16 %v1384_v57, %v1703_v31  ;;  %v3717_v63 = vor.u32 %v2960_v14, %v2733_v42  ;;  %v1436_v45 = vsel %vm781_vm15, %v1432_v36, %v1404_v41 }
 0x139   :  { %1978 = vmatpush.bf16.msrb.mxu1 %v2978_v0  ;;  %v4136_v61 = vunpack.c.l.b16 %v3404_v59  ;;  %v3722_v17 = vpack.c.b16 %v1711_v11, %v1711_v11  ;;  %v1805_v21 = vunpack.c.l.b16 %v1791_v24  ;;  %v1440_v54 = vsel %vm786_vm5, %v1436_v45, %v1426_v8 }
 0x13a   :  { %v1150_v18 = vrot.slane %v1148_v10, 6  ;;  %v1558_v19 = vunpack.c.l.b16 %v1506_v44  ;;  %v1154_v57 = vrot.slane %v3706_v2, 2  ;;  %v1699_v58 = vrot.slane %v3708_v34, 7  ;;  %v2741_v10 = vld [vmem:[#allocation2 + $0x1c] sm:$0xc] }
 0x13b   :  { %v1689_v6 = vpack.c.b16 %v4136_v61, %v1687_v23  ;;  %v1804_v28 = vunpack.c.l.b16 %v3715_v20  ;;  %v3729_v41 = vpack.c.b16 %v1514_v49, %v1514_v49  ;;  %v4137_v59 = vshrl.u32 %v3249_v35, 16  ;;  %v3003_v20 = vld [vmem:[%s4073_s2 + $0x1f8] sm:$0xff] }
 0x13c   :  { %v4138_v0 = vshll.u32 %v3249_v35, 16  ;;  %v1707_v31 = vrot.slane %v3713_v15, 7  ;;  %v4112_v30 = vshll.u32 %v3717_v63, 16  ;;  %v1158_v23 = vsel %vm403_vm2, 0, %v1142_v29 }
 0x13d   :  { %v1887_v11 = vrot.slane %v4137_v59, 3  ;;  %v1691_v37 = vrot.slane %v1689_v6, 3  ;;  %v1715_v14 = vrot.slane %v3722_v17, 3  ;;  %v1808_v8 = vpack.c.b16 %v1805_v21, %v1804_v28 }
 0x13e   :  { %2730 = vmatmul.msk.bf16.gmra.mxu3 %vm927_vm12, %v1440_v54  ;;  %v1888_v3 = vrot.slane %v4138_v0, 4  ;;  %v1162_v24 = vsel %vm781_vm15, %v1158_v23, %v1150_v18  ;;  %v3742_v42 = vpack.c.b16 %v1558_v19, %v1558_v19  ;;  %v3744_v44 = vor.u32 %v2962_v48, %v2741_v10  ;;  %v1678_v18 = vld [vmem:[#allocation2 + $0x28] sm:$0x8]  ;;  %v1680_v0 = vld [vmem:[#allocation2 + $0x34] sm:$0x6] }
 0x13f   :  { %v4139_v35 = vshrl.u32 %v3269_v5, 16  ;;  %v1166_v36 = vsel %vm786_vm5, %v1162_v24, %v1154_v57  ;;  %v1719_v29 = vsel %vm403_vm2, %v1691_v37, %v1699_v58  ;;  %v1521_v45 = vshll.u32 %v3729_v41, 16  ;;  %v1682_v23 = vld [vmem:[#allocation2 + $0x3c] sm:$0x8] }
 0x140   :  { %v4140_v61 = vshll.u32 %v3269_v5, 16  ;;  %v1724_v21 = vsel %vm781_vm15, %v1719_v29, %v1707_v31  ;;  %v1547_v54 = vrot.slane %v4112_v30, 1  ;;  %v4141_v19 = vor.u32 %v3288_v38, %v3277_v26  ;;  %v1684_v38 = vld [vmem:[#allocation2 + $0x48] sm:$0x6] }
 0x141   :  { %v2010_v49 = vrot.slane %v4139_v35, 5  ;;  %v4142_v57 = vor.u32 %v3226_v1, %v3206_v32  ;;  %v1728_v48 = vsel %vm786_vm5, %v1724_v21, %v1715_v14  ;;  %v1810_v5 = vrot.slane %v1808_v8, 5 }
 0x142   :  { %v2011_v6 = vrot.slane %v4140_v61, 6  ;;  %v1543_v59 = vshrl.u32 %v3717_v63, 16  ;;  %v1889_v31 = vor.u32 %v1888_v3, %v1887_v11  ;;  %v1519_v37 = vshrl.u32 %v3729_v41, 16 }
 0x143   :  { %v2040_v58 = vsel %vm403_vm2, %v4142_v57, %v4141_v19  ;;  %v1563_v10 = vshrl.u32 %v3742_v42, 16  ;;  %v1566_v24 = vshll.u32 %v3742_v42, 16  ;;  %v4111_v26 = vshrl.u32 %v3744_v44, 16 }
 0x144   :  { %2694 = vmatmul.msk.bf16.gmra.mxu1 %vm927_vm12, %v1166_v36  ;;  %v1523_v32 = vrot.slane %v1521_v45, 1  ;;  %v1592_v1 = vshll.u32 %v3744_v44, 16  ;;  %v1688_v35 = vunpack.c.l.b16 %v1678_v18  ;;  %v1925_v14 = vsel %vm403_vm2, %v1889_v31, %v3320_v50 }
 0x145   :  { %v1548_v11 = vor.u32 %v1547_v54, %v1543_v59  ;;  %v1696_v41 = vunpack.c.l.b16 %v1680_v0  ;;  %v2449_v3 = vrot.slane %v3708_v34, 1  ;;  %v2451_v8 = vrot.slane %v3713_v15, 1 }
 0x146   :  { %v1704_v36 = vunpack.c.l.b16 %v1682_v23  ;;  %v1712_v29 = vunpack.c.l.b16 %v1684_v38  ;;  %v4143_v45 = vshll.u32 %v3567_v43, 16  ;;  %v4144_v21 = vshll.u32 %v3573_v22, 16 }
 0x147   :  { %2781 = vmatmul.msk.bf16.vlgmr.msra.gmra.mxu2 %vm927_vm12, %v1728_v48  ;;  %v1565_v50 = vrot.slane %v1563_v10, 4  ;;  %v1568_v19 = vrot.slane %v1566_v24, 5  ;;  %v1591_v54 = vrot.slane %v4111_v26, 4  ;;  %v3789_v34 = vsel %vm403_vm2, %v2449_v3, %v2451_v8 }
 0x148   :  { %v2275_v61 = vrot.slane %v4143_v45, 1  ;;  %v2279_v18 = vrot.slane %v4144_v21, 1  ;;  %v1594_v15 = vrot.slane %v1592_v1, 5  ;;  %v2012_v57 = vor.u32 %v2011_v6, %v2010_v49  ;;  %v1793_v6 = vld [vmem:[#allocation2 + $0x4c] sm:$0x1] }
 0x149   :  { %v4145_v48 = vshrl.u32 %v3567_v43, 16  ;;  %v4146_v23 = vshrl.u32 %v3573_v22, 16  ;;  %v4147_v38 = vunpack.c.l.b16 %v3614_v46  ;;  %v3799_v21 = vpack.c.b16 %v1696_v41, %v1696_v41  ;;  %v3809_v43 = vld [vmem:[#allocation2 + $0x48] sm:$0x8] }
 0x14a   :  { %v1795_v26 = vrot.slane %v3410_v16, 1  ;;  %v1797_v3 = vrot.slane %v3444_v25, 1  ;;  %v4148_v8 = vunpack.c.l.b16 %v3622_v40  ;;  %v3807_v49 = vpack.c.b16 %v1712_v29, %v1712_v29  ;;  %v2985_v46 = vld [vmem:[%s4073_s2 + $0x168] sm:$0xff] }
 0x14b   :  { %v2276_v0 = vor.u32 %v2275_v61, %v4145_v48  ;;  %v2280_v31 = vor.u32 %v2279_v18, %v4146_v23  ;;  %v1690_v45 = vpack.c.b16 %v4147_v38, %v1688_v35  ;;  %v1799_v22 = vrot.slane %v3478_v33, 5  ;;  %2175 = vmatpush.bf16.msrb.mxu3 %v2985_v46  ;;  %v1507_v48 = vld [vmem:[#allocation2 + $0x3c] sm:$0x7]  ;;  %v2963_v23 = vld [vmem:[#allocation2 + $0x44] sm:$0x10] }
 0x14c   :  { %v3805_v30 = vpack.c.b16 %v4148_v8, %v1704_v36  ;;  %v3816_v35 = vsel %vm781_vm15, %v2040_v58, %v2012_v57  ;;  %v1823_v16 = vsel %vm786_vm5, %v3702_v51, %v1810_v5  ;;  %v1569_v25 = vor.u32 %v1568_v19, %v1565_v50  ;;  %v1501_v19 = vld [vmem:[#allocation2 + $0x28] sm:$0x7]  ;;  %v2980_v8 = vld [vmem:[%s4073_s2 + $0x140] sm:$0xff] }
 0x14d   :  { %v1817_v40 = vsel %vm403_vm2, %v1795_v26, %v1797_v3  ;;  %v3822_v41 = vsel %vm403_vm2, %v2276_v0, %v2280_v31  ;;  %v1524_v36 = vor.u32 %v1523_v32, %v1519_v37  ;;  %v1595_v33 = vor.u32 %v1594_v15, %v1591_v54  ;;  %v2737_v54 = vld [vmem:[#allocation2 + $0x30] sm:$0xc]  ;;  %v2961_v15 = vld [vmem:[#allocation2 + $0x30] sm:$0x10]  ;;  %v2745_v0 = vld [vmem:[#allocation2 + $0x44] sm:$0xc]  ;;  %2095 = vmatpush.bf16.msrb.mxu2 %v2980_v8 }
 0x14e   :  { %2799 = vmatmul.msk.bf16.vlgmr.msra.gmra.mxu3 %vm927_vm12, %v1823_v16  ;;  %v3826_v29 = vsel %vm781_vm15, %v1817_v40, %v1799_v22  ;;  %v1700_v61 = vrot.slane %v3799_v21, 7  ;;  %v1806_v58 = vunpack.c.l.b16 %v3809_v43  ;;  %v1807_v18 = vunpack.c.l.b16 %v1793_v6  ;;  %v2977_v3 = vld [vmem:[%s4073_s2 + $0x128] sm:$0xff]  ;;  %v2984_v6 = vld [vmem:[%s4073_s2 + $0x160] sm:$0xff] }
 0x14f   :  { %v3832_v51 = vsel %vm781_vm15, %v1925_v14, %v3328_v7  ;;  %v1606_v5 = vsel %vm403_vm2, %v1524_v36, %v1548_v11  ;;  %v1692_v26 = vrot.slane %v1690_v45, 3  ;;  %v1708_v50 = vrot.slane %v3805_v30, 7  ;;  %1979 = vmatpush.bf16.msrb.mxu1 %v2977_v3  ;;  %2176 = vmatpush.bf16.msrb.mxu3 %v2984_v6  ;;  %v2999_v3 = vld [vmem:[%s4073_s2 + $0x1d8] sm:$0xff] }
 0x150   :  { %v1716_v37 = vrot.slane %v3807_v49, 3  ;;  %v1611_v32 = vsel %vm781_vm15, %v1606_v5, %v1569_v25  ;;  %v1515_v31 = vunpack.c.l.b16 %v1501_v19  ;;  %v3839_v7 = vor.u32 %v2961_v15, %v2737_v54  ;;  %v1996_v25 = vld [vmem:[#allocation2 + $0x24] sm:$0x3] }
 0x151   :  { %v1615_v57 = vsel %vm786_vm5, %v1611_v32, %v1595_v33  ;;  %v1722_v14 = vsel %vm403_vm2, %v1692_v26, %v1700_v61  ;;  %v1809_v11 = vpack.c.b16 %v1807_v18, %v1806_v58  ;;  %v1559_v38 = vunpack.c.l.b16 %v1507_v48  ;;  %2430 = vmatpush.bf16.msra.mxu2 %v2999_v3 }
 0x152   :  { %v3845_v45 = vor.u32 %v2963_v23, %v2745_v0  ;;  %v1726_v22 = vsel %vm781_vm15, %v1722_v14, %v1708_v50  ;;  %v1517_v46 = vpack.c.b16 %v1515_v31, %v1515_v31  ;;  %v4113_v16 = vshll.u32 %v3839_v7, 16 }
 0x153   :  { %v3858_v40 = vpack.c.b16 %v1559_v38, %v1559_v38  ;;  %v2018_v61 = vunpack.c.l.b16 %v1996_v25  ;;  %v4149_v18 = vshll.u32 %v3412_v27, 16  ;;  %v1730_v26 = vsel %vm786_vm5, %v1726_v22, %v1716_v37  ;;  %v2976_v38 = vld [vmem:[%s4073_s2 + $0x120] sm:$0xff]  ;;  %v2995_v25 = vld [vmem:[%s4073_s2 + $0x1b8] sm:$0xff]  ;;  %2507 = vmatpush.bf16.msra.mxu3 %v3003_v20  ;;  %v1997_v20 = vld [vmem:[#allocation2 + $0x4c] sm:$0x3] }
 0x154   :  { %2763 = vmatmul.msk.bf16.vlgmr.msra.gmra.mxu1 %vm927_vm12, %v1615_v57  ;;  %v1597_v36 = vshrl.u32 %v3845_v45, 16  ;;  %v4114_v33 = vshll.u32 %v3845_v45, 16  ;;  %v1528_v32 = vshll.u32 %v1517_v46, 16  ;;  %v4150_v50 = vshll.u32 %v3457_v55, 16  ;;  %v1885_v22 = vld [vmem:[#allocation2 + $0x24] sm:$0xe] }
 0x155   :  { %v2002_v5 = vrot.slane %v4149_v18, 2  ;;  %v1811_v54 = vrot.slane %v1809_v11, 5  ;;  %v1571_v15 = vshrl.u32 %v3858_v40, 16  ;;  %v1574_v57 = vshll.u32 %v3858_v40, 16  ;;  %1980 = vmatpush.bf16.msrb.mxu1 %v2976_v38  ;;  %v2998_v18 = vld [vmem:[%s4073_s2 + $0x1d0] sm:$0xff] }
 0x156   :  { %v2008_v19 = vrot.slane %v4150_v50, 2  ;;  %v1554_v48 = vrot.slane %v4113_v16, 1  ;;  %v1599_v0 = vrot.slane %v1597_v36, 4  ;;  %v1602_v37 = vrot.slane %v4114_v33, 5  ;;  %2431 = vmatpush.bf16.msra.mxu2 %v2998_v18 }
 0x157   :  { %2782 = vmatmul.msk.bf16.gmra.mxu2 %vm927_vm12, %v1730_v26  ;;  %v2020_v23 = vpack.c.b16 %v2018_v61, %v1804_v28  ;;  %v1530_v31 = vrot.slane %v1528_v32, 1  ;;  %v1573_v14 = vrot.slane %v1571_v15, 4  ;;  %v1576_v11 = vrot.slane %v1574_v57, 5 }
 0x158   :  { %v4115_v28 = vshrl.u32 %v3839_v7, 16  ;;  %v1526_v61 = vshrl.u32 %v1517_v46, 16  ;;  %v4151_v26 = vshrl.u32 %v3412_v27, 16  ;;  %v4152_v50 = vshrl.u32 %v3457_v55, 16  ;;  %v3002_v46 = vld [vmem:[%s4073_s2 + $0x1f0] sm:$0xff] }
 0x159   :  { %v2023_v8 = vshrl.u32 %v2020_v23, 16  ;;  %v2026_v6 = vshll.u32 %v2020_v23, 16  ;;  %v1825_v23 = vsel %vm786_vm5, %v3826_v29, %v1811_v54  ;;  %2341 = vmatpush.bf16.msra.mxu1 %v2995_v25  ;;  %v2994_v27 = vld [vmem:[%s4073_s2 + $0x1b0] sm:$0xff]  ;;  %v1577_v3 = vor.u32 %v1576_v11, %v1573_v14  ;;  %v2997_v25 = vld [vmem:[%s4073_s2 + $0x1c8] sm:$0xff]  ;;  %2508 = vmatpush.bf16.msra.mxu3 %v3002_v46  ;;  %v2111_v14 = vld [vmem:[#allocation2 + $0x24] sm:$0xc] }
 0x15a   :  { %v2001_v32 = vrot.slane %v4151_v26, 1  ;;  %v2007_v16 = vrot.slane %v4152_v50, 1  ;;  %v1555_v33 = vor.u32 %v1554_v48, %v4115_v28  ;;  %v1531_v38 = vor.u32 %v1530_v31, %v1526_v61  ;;  %2432 = vmatpush.bf16.msra.mxu2 %v2997_v25  ;;  %v2992_v61 = vld [vmem:[%s4073_s2 + $0x1a0] sm:$0xff] }
 0x15b   :  { %v1603_v55 = vor.u32 %v1602_v37, %v1599_v0  ;;  %v1903_v26 = vunpack.c.l.b16 %v1885_v22  ;;  %v2025_v29 = vrot.slane %v2023_v8, 5  ;;  %v2028_v54 = vrot.slane %v2026_v6, 6  ;;  %v3001_v0 = vld [vmem:[%s4073_s2 + $0x1e8] sm:$0xff]  ;;  %v2996_v8 = vld [vmem:[%s4073_s2 + $0x1c0] sm:$0xff] }
 0x15c   :  { %v2003_v50 = vor.u32 %v2002_v5, %v2001_v32  ;;  %v2009_v48 = vor.u32 %v2008_v19, %v2007_v16  ;;  %v1609_v28 = vsel %vm403_vm2, %v1531_v38, %v1555_v33  ;;  %v2019_v11 = vunpack.c.l.b16 %v1997_v20  ;;  %v2993_v33 = vld [vmem:[%s4073_s2 + $0x1a8] sm:$0xff]  ;;  %v988_v32 = vpop.f32.mrf.mxu2 }
 0x15d   :  { %2342 = vmatpush.bf16.msra.mxu1 %v2994_v27  ;;  %v1613_v5 = vsel %vm781_vm15, %v1609_v28, %v1577_v3  ;;  %v1905_v16 = vpack.c.b16 %v1903_v26, %v1903_v26  ;;  %v2029_v37 = vor.u32 %v2028_v54, %v2025_v29  ;;  %2509 = vmatpush.bf16.msra.mxu3 %v3001_v0  ;;  %v3000_v28 = vld [vmem:[%s4073_s2 + $0x1e0] sm:$0xff]  ;;  %v2115_v6 = vunpack.c.l.b16 %v2111_v14  ;;  %v3004_v0 = vld [vmem:[#allocation2 + $0x8] sm:$0x3] }
 0x15e   :  { %2800 = vmatmul.msk.bf16.gmra.mxu3 %vm927_vm12, %v1825_v23  ;;  %v3918_v31 = vsel %vm403_vm2, %v2003_v50, %v2009_v48  ;;  %v1617_v19 = vsel %vm786_vm5, %v1613_v5, %v1603_v55  ;;  %v2453_v18 = vrot.slane %v3722_v17, 5  ;;  %v2021_v27 = vpack.c.b16 %v2019_v11, %v1806_v58  ;;  %2433 = vmatpush.bf16.msra.mxu2 %v2996_v8  ;;  %v1886_v5 = vld [vmem:[#allocation2 + $0x4c] sm:$0xe] }
 0x15f   :  { %v1908_v22 = vshrl.u32 %v1905_v16, 16  ;;  %v2049_v23 = vsel %vm786_vm5, %v3816_v35, %v2029_v37  ;;  %v1911_v46 = vshll.u32 %v1905_v16, 16  ;;  %v4153_v38 = vshrl.u32 %v3575_v52, 16 }
 0x160   :  { %v3948_v55 = vsel %vm781_vm15, %v3789_v34, %v2453_v18  ;;  %v4154_v26 = vshll.u32 %v3575_v52, 16  ;;  %v2117_v35 = vpack.c.b16 %v2115_v6, %v2115_v6  ;;  %v2031_v48 = vshrl.u32 %v2021_v27, 16 }
 0x161   :  { %2343 = vmatpush.bf16.msra.mxu1 %v2993_v33  ;;  %v2283_v3 = vrot.slane %v4153_v38, 4  ;;  %v1123_v29 = vpop.f32.mrf.mxu3  ;;  %2510 = vmatpush.bf16.msra.mxu3 %v3000_v28  ;;  %v1910_v58 = vrot.slane %v1908_v22, 3  ;;  %v1913_v50 = vrot.slane %v1911_v46, 4  ;;  %v2034_v20 = vshll.u32 %v2021_v27, 16  ;;  %v2112_v46 = vld [vmem:[#allocation2 + $0x4c] sm:$0xc] }
 0x162   :  { %v2284_v17 = vrot.slane %v4154_v26, 5  ;;  %v2121_v34 = vsel %vm403_vm2, %v3004_v0, %v3577_v39  ;;  %v4155_v14 = vshrl.u32 %v3492_v47, 16  ;;  %v4156_v33 = vshll.u32 %v3492_v47, 16 }
 0x163   :  { %v2126_v16 = vsel %vm781_vm15, %v2121_v34, %v3627_v9  ;;  %v1914_v39 = vor.u32 %v1913_v50, %v1910_v58  ;;  %v2033_v28 = vrot.slane %v2031_v48, 5  ;;  %v2036_v6 = vrot.slane %v2034_v20, 6 }
 0x164   :  { %2764 = vmatmul.msk.bf16.gmra.mxu1 %vm927_vm12, %v1617_v19  ;;  %v2285_v54 = vor.u32 %v2284_v17, %v2283_v3  ;;  %v2130_v37 = vsel %vm786_vm5, %v2126_v16, %v2117_v35  ;;  %v2013_v11 = vrot.slane %v4155_v14, 5  ;;  %v2014_v8 = vrot.slane %v4156_v33, 6  ;;  %v990_v22 = vpop.f32.mrf.mxu2  ;;  %v3005_v14 = vld [vmem:[#allocation2 + $0x30] sm:$0x3] }
 0x165   :  { %2344 = vmatpush.bf16.msra.mxu1 %v2992_v61  ;;  %v2116_v26 = vunpack.c.l.b16 %v2112_v46  ;;  %v4158_v50 = vshrl.u32 %v3531_v62, 16  ;;  %v2367_v20 = vrot.slane %v1566_v24, 7  ;;  %v4160_v34 = vshll.u32 %v3460_v56, 16 }
 0x166   :  { %v3956_v52 = vsel %vm781_vm15, %v3822_v41, %v2285_v54  ;;  %v1904_v41 = vunpack.c.l.b16 %v1886_v5  ;;  %v2015_v61 = vor.u32 %v2014_v8, %v2013_v11  ;;  %v4161_v11 = vshll.u32 %v3717_v63, 16 }
 0x167   :  { %2835 = vmatmul.msk.bf16.vlgmr.msrb.gmra.mxu2 %vm927_vm12, %v2049_v23  ;;  %v2037_v23 = vor.u32 %v2036_v6, %v2033_v28  ;;  %v2118_v58 = vpack.c.b16 %v2116_v26, %v2116_v26  ;;  %v1899_v48 = vrot.slane %v4158_v50, 7  ;;  %v1891_v5 = vrot.slane %v4160_v34, 4 }
 0x168   :  { %v1906_v27 = vpack.c.b16 %v1904_v41, %v1904_v41  ;;  %v2047_v3 = vsel %vm781_vm15, %v3918_v31, %v2015_v61  ;;  %v2366_v31 = vrot.slane %v1563_v10, 6  ;;  %v2361_v33 = vrot.slane %v4161_v11, 3 }
 0x169   :  { %v1125_v9 = vpop.f32.mrf.mxu3  ;;  %v2051_v17 = vsel %vm786_vm5, %v2047_v3, %v2037_v23  ;;  %v4162_v10 = vshrl.u32 %v3744_v44, 16  ;;  %v2373_v42 = vrot.slane %v1592_v1, 7  ;;  %v2450_v28 = vrot.slane %v3799_v21, 1 }
 0x16a   :  { %v941_v43 = vpop.f32.mrf.mxu1  ;;  %v1919_v35 = vshll.u32 %v1906_v27, 16  ;;  %v2452_v6 = vrot.slane %v3805_v30, 1  ;;  %v4164_v63 = vshll.u32 %v3531_v62, 16  ;;  %v2368_v1 = vor.u32 %v2367_v20, %v2366_v31 }
 0x16b   :  { %v989_v25 = vadd.f32 %v988_v32, %v941_v43  ;;  %v1934_v32 = vsel %vm786_vm5, %v3832_v51, %v1914_v39  ;;  %v4157_v51 = vshrl.u32 %v3513_v4, 16  ;;  %v2360_v43 = vrot.slane %v1543_v59, 2 }
 0x16c   :  { %v2124_v59 = vsel %vm403_vm2, %v3005_v14, %v3659_v13  ;;  %v2372_v8 = vrot.slane %v4162_v10, 6  ;;  %v1900_v41 = vor.u32 %v1899_v48, %v4164_v63  ;;  %v2460_v61 = vsel %vm403_vm2, %v2450_v28, %v2452_v6 }
 0x16d   :  { %v3960_v19 = vadd.f32 %v1123_v29, %v989_v25  ;;  %v1916_v29 = vshrl.u32 %v1906_v27, 16  ;;  %v1895_v54 = vrot.slane %v4157_v51, 7  ;;  %v4159_v25 = vshrl.u32 %v3460_v56, 16 }
 0x16e   :  { %2853 = vmatmul.msk.bf16.vlgmr.msrb.gmra.mxu3 %vm927_vm12, %v2130_v37  ;;  %v1921_v37 = vrot.slane %v1919_v35, 4  ;;  %v2128_v24 = vsel %vm781_vm15, %v2124_v59, %v3706_v2  ;;  %v4163_v56 = vshll.u32 %v3513_v4, 16  ;;  %v2374_v2 = vor.u32 %v2373_v42, %v2372_v8 }
 0x16f   :  { %v1890_v0 = vrot.slane %v4159_v25, 3  ;;  %v1918_v16 = vrot.slane %v1916_v29, 3  ;;  %v2132_v13 = vsel %vm786_vm5, %v2128_v24, %v2118_v58  ;;  %v2454_v30 = vrot.slane %v3807_v49, 5 }
 0x170   :  { %v1896_v39 = vor.u32 %v1895_v54, %v4163_v56  ;;  %v2369_v27 = vrot.slane %v1571_v15, 6  ;;  %v2370_v49 = vrot.slane %v1574_v57, 7  ;;  %v4165_v3 = vshll.u32 %v3845_v45, 16 }
 0x171   :  { %v1922_v44 = vor.u32 %v1921_v37, %v1918_v16  ;;  %v2464_v23 = vsel %vm781_vm15, %v2460_v61, %v2454_v30  ;;  %v4167_v35 = vshll.u32 %v3839_v7, 16  ;;  %v2465_v54 = vsel %vm786_vm5, %v3948_v55, 0 }
 0x172   :  { %v943_v18 = vpop.f32.mrf.mxu1  ;;  %v2376_v26 = vrot.slane %v4165_v3, 7  ;;  %v2371_v15 = vor.u32 %v2370_v49, %v2369_v27  ;;  %v4168_v58 = vshll.u32 %v3639_v60, 16  ;;  %v4169_v55 = vshrl.u32 %v3643_v12, 16 }
 0x173   :  { %v991_v38 = vadd.f32 %v990_v22, %v943_v18  ;;  %v1892_v22 = vor.u32 %v1891_v5, %v1890_v0  ;;  %v2362_v18 = vor.u32 %v2361_v33, %v2360_v43  ;;  %v2364_v51 = vrot.slane %v4167_v35, 3 }
 0x174   :  { %2817 = vmatmul.msk.bf16.vlgmr.msrb.gmra.mxu1 %vm927_vm12, %v1934_v32  ;;  %v2281_v50 = vrot.slane %v4168_v58, 1  ;;  %v2286_v48 = vrot.slane %v4169_v55, 4  ;;  %v4170_v31 = vshll.u32 %v3643_v12, 16  ;;  %v4172_v34 = vshrl.u32 %v3639_v60, 16 }
 0x175   :  { %v3971_v47 = vadd.f32 %v1125_v9, %v991_v38  ;;  %v1928_v4 = vsel %vm403_vm2, %v1892_v22, %v1896_v39  ;;  %v2380_v62 = vsel %vm403_vm2, %v2362_v18, %v2368_v1  ;;  %v2375_v38 = vrot.slane %v1597_v36, 6 }
 0x176   :  { %v1932_v21 = vsel %vm781_vm15, %v1928_v4, %v1900_v41  ;;  %v2385_v32 = vsel %vm781_vm15, %v2380_v62, %v2374_v2  ;;  %v2299_v36 = vsel %vm786_vm5, %v3956_v52, 0  ;;  %v2287_v20 = vrot.slane %v4170_v31, 5 }
 0x177   :  { %2836 = vmatmul.msk.bf16.gmra.mxu2 %vm927_vm12, %v2051_v17  ;;  %v1936_v9 = vsel %vm786_vm5, %v1932_v21, %v1922_v44  ;;  %v2388_v46 = vsel %vm786_vm5, %v2385_v32, 0  ;;  %v4166_v17 = vshrl.u32 %v3839_v7, 16  ;;  %v2377_v40 = vor.u32 %v2376_v26, %v2375_v38 }
 0x178   :  { %v4171_v52 = vshll.u32 %v3634_v53, 16  ;;  %v2282_v5 = vor.u32 %v2281_v50, %v4172_v34  ;;  %v2288_v16 = vor.u32 %v2287_v20, %v2286_v48  ;;  %v4173_v37 = vshrl.u32 %v3634_v53, 16 }
 0x179   :  { %v2363_v29 = vrot.slane %v4166_v17, 2  ;;  %v2466_v59 = vsel %vm786_vm5, %v2464_v23, 0  ;;  %vm2566_vm8 = vcmask 1041409   ;;  %vm2569_vm6 = vcmask 123904  }
 0x17a   :  { %v2277_v25 = vrot.slane %v4171_v52, 1  ;;  %vm2573_vm7 = vcmask 1024  }
 0x17b   :  { %v2365_v57 = vor.u32 %v2364_v51, %v2363_v29 }
 0x17c   :  { %v2278_v14 = vor.u32 %v2277_v25, %v4173_v37 }
 0x17d   :  { %v2383_v45 = vsel %vm403_vm2, %v2365_v57, %v2371_v15 }
 0x17e   :  { %2854 = vmatmul.msk.bf16.gmra.mxu3 %vm927_vm12, %v2132_v13  ;;  %v2387_v43 = vsel %vm781_vm15, %v2383_v45, %v2377_v40  ;;  %v2294_v11 = vsel %vm403_vm2, %v2278_v14, %v2282_v5  ;;  %vm2561_vm2 = vcmask 130112  }
 0x17f   :  { %v2389_v7 = vsel %vm786_vm5, %v2387_v43, 0  ;;  %v2298_v12 = vsel %vm781_vm15, %v2294_v11, %v2288_v16 }
 0x180   :  { %v2300_v42 = vsel %vm786_vm5, %v2298_v12, 0 }
 0x184   :  { %2818 = vmatmul.msk.bf16.gmra.mxu1 %vm927_vm12, %v1936_v9 }
 0x187   :  { %2907 = vmatmul.msk.bf16.vlgmr.msra.gmra.mxu2 %vm927_vm12, %v2388_v46 }
 0x18e   :  { %2925 = vmatmul.msk.bf16.vlgmr.msra.gmra.mxu3 %vm927_vm12, %v2465_v54 }
 0x194   :  { %2889 = vmatmul.msk.bf16.vlgmr.msra.gmra.mxu1 %vm927_vm12, %v2299_v36 }
 0x197   :  { %2908 = vmatmul.msk.bf16.gmra.mxu2 %vm927_vm12, %v2389_v7 }
 0x19a   :  { %v993_v0 = vpop.f32.mrf.mxu2 }
 0x19e   :  { %2926 = vmatmul.msk.bf16.gmra.mxu3 %vm927_vm12, %v2466_v59 }
 0x1a1   :  { %v946_v33 = vpop.f32.mrf.mxu1  ;;  %v1128_v8 = vpop.f32.mrf.mxu3 }
 0x1a2   :  { %v994_v10 = vadd.f32 %v993_v0, %v946_v33  ;;  %v995_v24 = vpop.f32.mrf.mxu2 }
 0x1a4   :  { %v1135_v60 = vadd.f32 %v1128_v8, %v994_v10  ;;  %2890 = vmatmul.msk.bf16.gmra.mxu1 %vm927_vm12, %v2300_v42  ;;  %v2261_v42 = vpop.f32.mrf.mxu0 }
 0x1a9   :  { %v948_v56 = vpop.f32.mrf.mxu1  ;;  %v1130_v39 = vpop.f32.mrf.mxu3 }
 0x1aa   :  { %v996_v53 = vadd.f32 %v995_v24, %v948_v56  ;;  %v1305_v28 = vpop.f32.mrf.mxu2 }
 0x1ac   :  { %v1136_v6 = vadd.f32 %v1130_v39, %v996_v53 }
 0x1b1   :  { %v1212_v13 = vpop.f32.mrf.mxu1  ;;  %v1486_v41 = vpop.f32.mrf.mxu3 }
 0x1b2   :  { %v1222_v63 = vadd.f32 %v1212_v13, %v3960_v19  ;;  %v1307_v22 = vpop.f32.mrf.mxu2 }
 0x1b4   :  { %v1315_v44 = vadd.f32 %v1305_v28, %v1222_v63 }
 0x1b6   :  { %v1496_v1 = vadd.f32 %v1486_v41, %v1315_v44 }
 0x1b9   :  { %v1214_v61 = vpop.f32.mrf.mxu1  ;;  %v1488_v4 = vpop.f32.mrf.mxu3 }
 0x1ba   :  { %v1223_v2 = vadd.f32 %v1214_v61, %v3971_v47  ;;  %v1310_v18 = vpop.f32.mrf.mxu2 }
 0x1bc   :  { %v1316_v21 = vadd.f32 %v1307_v22, %v1223_v2  ;;  %v2263_v2 = vpop.f32.mrf.mxu0 }
 0x1be   :  { %v1497_v30 = vadd.f32 %v1488_v4, %v1316_v21 }
 0x1c1   :  { %v1217_v9 = vpop.f32.mrf.mxu1  ;;  %v1491_v32 = vpop.f32.mrf.mxu3 }
 0x1c2   :  { %v1224_v62 = vadd.f32 %v1217_v9, %v1135_v60  ;;  %v1312_v23 = vpop.f32.mrf.mxu2 }
 0x1c4   :  { %v1317_v46 = vadd.f32 %v1310_v18, %v1224_v62 }
 0x1c6   :  { %v1498_v27 = vadd.f32 %v1491_v32, %v1317_v46  ;;  %v2538_v32 = vld [vmem:[%s4074_s3] sm:$0xff] }
 0x1c9   :  { %v1219_v49 = vpop.f32.mrf.mxu1  ;;  %v1493_v19 = vpop.f32.mrf.mxu3 }
 0x1ca   :  { %v1225_v38 = vadd.f32 %v1219_v49, %v1136_v6  ;;  %v1776_v3 = vpop.f32.mrf.mxu2 }
 0x1cc   :  { %v1318_v26 = vadd.f32 %v1312_v23, %v1225_v38 }
 0x1ce   :  { %v1499_v17 = vadd.f32 %v1493_v19, %v1318_v26 }
 0x1d1   :  { %v1663_v29 = vpop.f32.mrf.mxu1  ;;  %v1871_v35 = vpop.f32.mrf.mxu3 }
 0x1d2   :  { %v1778_v51 = vpop.f32.mrf.mxu2  ;;  %v1673_v31 = vadd.f32 %v1663_v29, %v1496_v1  ;;  %v2266_v29 = vpop.f32.mrf.mxu0 }
 0x1d4   :  { %v1786_v25 = vadd.f32 %v1776_v3, %v1673_v31 }
 0x1d6   :  { %v1881_v34 = vadd.f32 %v1871_v35, %v1786_v25 }
 0x1d9   :  { %v1665_v47 = vpop.f32.mrf.mxu1  ;;  %v1873_v54 = vpop.f32.mrf.mxu3 }
 0x1da   :  { %v1781_v15 = vpop.f32.mrf.mxu2  ;;  %v1674_v5 = vadd.f32 %v1665_v47, %v1497_v30 }
 0x1dc   :  { %v1787_v59 = vadd.f32 %v1778_v51, %v1674_v5 }
 0x1de   :  { %v1882_v33 = vadd.f32 %v1873_v54, %v1787_v59 }
 0x1e1   :  { %v1668_v40 = vpop.f32.mrf.mxu1  ;;  %v1876_v57 = vpop.f32.mrf.mxu3 }
 0x1e2   :  { %v1783_v36 = vpop.f32.mrf.mxu2  ;;  %v1675_v10 = vadd.f32 %v1668_v40, %v1498_v27 }
 0x1e4   :  { %v1788_v53 = vadd.f32 %v1781_v15, %v1675_v10  ;;  %v2539_v15 = vld [vmem:[%s4074_s3 + $0x8] sm:$0xff]  ;;  %v2556_v10 = vlaneseq }
 0x1e6   :  { %v1883_v13 = vadd.f32 %v1876_v57, %v1788_v53 }
 0x1e9   :  { %v1670_v45 = vpop.f32.mrf.mxu1  ;;  %v1878_v43 = vpop.f32.mrf.mxu3 }
 0x1ea   :  { %v2097_v7 = vpop.f32.mrf.mxu2  ;;  %v1676_v63 = vadd.f32 %v1670_v45, %v1499_v17 }
 0x1ec   :  { %v1789_v4 = vadd.f32 %v1783_v36, %v1676_v63 }
 0x1ee   :  { %v1884_v46 = vadd.f32 %v1878_v43, %v1789_v4 }
 0x1f1   :  { %v1982_v58 = vpop.f32.mrf.mxu1  ;;  %v2178_v50 = vpop.f32.mrf.mxu3 }
 0x1f2   :  { %v2099_v55 = vpop.f32.mrf.mxu2  ;;  %v1992_v14 = vadd.f32 %v1982_v58, %v1881_v34 }
 0x1f4   :  { %v2107_v11 = vadd.f32 %v2097_v7, %v1992_v14 }
 0x1f6   :  { %v2188_v24 = vadd.f32 %v2178_v50, %v2107_v11 }
 0x1f8   :  { %v2271_v28 = vadd.f32 %v2261_v42, %v2188_v24  ;;  %v2557_v42 = vand.u32 127, %v2556_v10 }
 0x1f9   :  { %v1984_v48 = vpop.f32.mrf.mxu1  ;;  %v2180_v20 = vpop.f32.mrf.mxu3 }
 0x1fa   :  { %v2102_v52 = vpop.f32.mrf.mxu2  ;;  %v1993_v60 = vadd.f32 %v1984_v48, %v1882_v33  ;;  %v2268_v48 = vpop.f32.mrf.mxu0  ;;  %v2559_v24 = vadd.s32 4294967288, %v2557_v42 }
 0x1fc   :  { %v2108_v39 = vadd.f32 %v2099_v55, %v1993_v60 }
 0x1fe   :  { %v2189_v44 = vadd.f32 %v2180_v20, %v2108_v39 }
 0x200   :  { %v2272_v62 = vadd.f32 %v2263_v2, %v2189_v44 }
 0x201   :  { %v1987_v0 = vpop.f32.mrf.mxu1  ;;  %v2183_v16 = vpop.f32.mrf.mxu3 }
 0x202   :  { %v2104_v37 = vpop.f32.mrf.mxu2  ;;  %v1994_v1 = vadd.f32 %v1987_v0, %v1883_v13 }
 0x204   :  { %v2109_v30 = vadd.f32 %v2102_v52, %v1994_v1 }
 0x206   :  { %v2190_v3 = vadd.f32 %v2183_v16, %v2109_v30 }
 0x208   :  { %v2273_v54 = vadd.f32 %v2266_v29, %v2190_v3 }
 0x209   :  { %v1989_v12 = vpop.f32.mrf.mxu1  ;;  %v2185_v8 = vpop.f32.mrf.mxu3 }
 0x20a   :  { %v2435_v56 = vpop.f32.mrf.mxu2  ;;  %v1995_v26 = vadd.f32 %v1989_v12, %v1884_v46 }
 0x20c   :  { %v2110_v51 = vadd.f32 %v2104_v37, %v1995_v26 }
 0x20e   :  { %v2191_v58 = vadd.f32 %v2185_v8, %v2110_v51 }
 0x210   :  { %v2274_v20 = vadd.f32 %v2268_v48, %v2191_v58 }
 0x211   :  { %v2346_v6 = vpop.f32.mrf.mxu1  ;;  %v2512_v22 = vpop.f32.mrf.mxu3 }
 0x212   :  { %v2356_v41 = vadd.f32 %v2346_v6, %v2271_v28  ;;  %v2437_v21 = vpop.f32.mrf.mxu2 }
 0x214   :  { %v2445_v61 = vadd.f32 %v2435_v56, %v2356_v41 }
 0x216   :  { %v2522_v18 = vadd.f32 %v2512_v22, %v2445_v61 }
 0x218   :  { %v2530_v9 = vmul.f32 0.2, %v2522_v18  ;;  %vm2526_vm10 = vcmp.ge.f32.partialorder %v2522_v18, 0.0 }
 0x219   :  { %v2348_v23 = vpop.f32.mrf.mxu1  ;;  %v2514_v49 = vpop.f32.mrf.mxu3 }
 0x21a   :  { %v2357_v27 = vadd.f32 %v2348_v23, %v2272_v62  ;;  %v2534_v38 = vsel %vm2526_vm10, %v2522_v18, %v2530_v9  ;;  %v2440_v40 = vpop.f32.mrf.mxu2 }
 0x21b   :  { %v2540_v19 = vmul.f32 %v2538_v32, %v2534_v38 }
 0x21c   :  { %v2446_v17 = vadd.f32 %v2437_v21, %v2357_v27 }
 0x21d   :  { %2544 = vadd.xlane.f32.xlu0 %v2540_v19 }
 0x21e   :  { %v2523_v35 = vadd.f32 %v2514_v49, %v2446_v17 }
 0x220   :  { %v2531_v47 = vmul.f32 0.2, %v2523_v35  ;;  %vm2527_vm11 = vcmp.ge.f32.partialorder %v2523_v35, 0.0 }
 0x221   :  { %v2351_v57 = vpop.f32.mrf.mxu1  ;;  %v2517_v45 = vpop.f32.mrf.mxu3 }
 0x222   :  { %v2358_v36 = vadd.f32 %v2351_v57, %v2273_v54  ;;  %v2535_v43 = vsel %vm2527_vm11, %v2523_v35, %v2531_v47  ;;  %v2442_v34 = vpop.f32.mrf.mxu2 }
 0x223   :  { %v2541_v7 = vmul.f32 %v2539_v15, %v2535_v43 }
 0x224   :  { %v2447_v50 = vadd.f32 %v2440_v40, %v2358_v36 }
 0x225   :  { %2546 = vadd.xlane.f32.xlu0 %v2541_v7 }
 0x226   :  { %v2524_v55 = vadd.f32 %v2517_v45, %v2447_v50 }
 0x228   :  { %v2532_v31 = vmul.f32 0.2, %v2524_v55  ;;  %vm2528_vm13 = vcmp.ge.f32.partialorder %v2524_v55, 0.0 }
 0x229   :  { %v2353_v52 = vpop.f32.mrf.mxu1  ;;  %v2519_v5 = vpop.f32.mrf.mxu3 }
 0x22a   :  { %v2359_v25 = vadd.f32 %v2353_v52, %v2274_v20  ;;  %v2536_v0 = vsel %vm2528_vm13, %v2524_v55, %v2532_v31 }
 0x22b   :  { %v2542_v16 = vmul.f32 %v2538_v32, %v2536_v0 }
 0x22c   :  { %v2448_v37 = vadd.f32 %v2442_v34, %v2359_v25 }
 0x22d   :  { %2548 = vadd.xlane.f32.xlu1 %v2542_v16 }
 0x22e   :  { %v2525_v14 = vadd.f32 %v2519_v5, %v2448_v37 }
 0x230   :  { %v2533_v59 = vmul.f32 0.2, %v2525_v14  ;;  %vm2529_vm4 = vcmp.ge.f32.partialorder %v2525_v14, 0.0 }
 0x232   :  { %v2537_v11 = vsel %vm2529_vm4, %v2525_v14, %v2533_v59 }
 0x233   :  { %v2543_v12 = vmul.f32 %v2539_v15, %v2537_v11 }
 0x235   :  { %2550 = vadd.xlane.f32.xlu1 %v2543_v12 }
 0x290   :  { %v2545_v33 = vpop.xlane.xlu0 %2544 }
 0x291   :  { %v2558_v39 = vperm.slane %v2545_v33, %v2557_v42 }
 0x298   :  { %v2547_v60 = vpop.xlane.xlu0 %2546 }
 0x299   :  { %v2560_v56 = vperm.slane %v2547_v60, %v2559_v24 }
 0x29b   :  { %v2562_v13 = vsel %vm2561_vm2, %v2560_v56, %v2558_v39 }
 0x2a0   :  { %v2549_v8 = vpop.xlane.xlu1 %2548 }
 0x2a1   :  { %v2563_v28 = vperm.slane %v2549_v8, %v2557_v42 }
 0x2a8   :  { %v2551_v53 = vpop.xlane.xlu1 %2550 }
 0x2a9   :  { %v2564_v6 = vperm.slane %v2551_v53, %v2559_v24 }
 0x2ab   :  { %v2565_v63 = vsel %vm2561_vm2, %v2564_v6, %v2563_v28 }
 0x2ac   :  { %v2567_v41 = vsel %vm2566_vm8, %v2565_v63, %v2562_v13 }
 0x2ad   :  { %v2570_v22 = vsel %vm2569_vm6, %v2567_v41, 0.0 }
 0x2ae   :  { %2571 = vadd.xlane.f32.xlu2 %v2570_v22 }
 0x321   :  { %v2572_v44 = vpop.xlane.xlu2 %2571 }
 0x322   :  { %2574 = vst.msk [vmem:[%s4075_s4] sm:$0x3] %vm2573_vm7, %v2572_v44 }

</bundles_post_ra>
